<compile_context>
chip_gen: v7x
topology: tpu7x:2x2x1
jax: 0.10.0
libtpu: 0.0.40
codegen_flags: <defaults>
</compile_context>

<pallas_src>
import functools
import math

import jax
import jax.numpy as jnp
from jax.experimental import pallas as pl
from jax.experimental.pallas import tpu as pltpu


def _layer_norm(x, gamma, beta, eps=1e-5):
    mu = jnp.mean(x, axis=-1, keepdims=True)
    xc = x - mu
    var = jnp.mean(xc * xc, axis=-1, keepdims=True)
    return xc * jax.lax.rsqrt(var + eps) * gamma + beta


def decoder_layer_kernel(
    tgt_ref, mem_ref, qpos_ref, pos_ref,
    wq_ref, bq_ref, wk_ref, bk_ref, wv_ref, bv_ref,
    wo_ref, bo_ref, g2_ref, be2_ref,
    w1_ref, b1_ref, w2_ref, b2_ref,
    g3_ref, be3_ref,
    out_ref,
    *, nhead,
):
    bb, T, D = tgt_ref.shape
    S = mem_ref.shape[1]
    dh = D // nhead
    cdt = wq_ref.dtype            # matmul-operand dtype (f32 demo / bf16 production)
    f32 = jnp.float32

    # with_pos_embed, flattened to (rows, D) so the projection matmuls fill MXU rows.
    q_in = (tgt_ref[...] + qpos_ref[...]).reshape(bb * T, D).astype(cdt)
    k_in = (mem_ref[...] + pos_ref[...]).reshape(bb * S, D).astype(cdt)
    v_in = mem_ref[...].reshape(bb * S, D).astype(cdt)

    # Full-width in-projections: (rows, D) @ (D, D), f32 accumulation.
    # The 1/sqrt(dh) softmax scale is pre-folded into wq/bq in the wrapper.
    q = jnp.dot(q_in, wq_ref[...], preferred_element_type=f32) + bq_ref[...]
    k = jnp.dot(k_in, wk_ref[...], preferred_element_type=f32) + bk_ref[...]
    v = jnp.dot(v_in, wv_ref[...], preferred_element_type=f32) + bv_ref[...]

    qc = q.astype(cdt)
    kc = k.astype(cdt)
    vc = v.astype(cdt)

    # Scaled dot-product attention. Heads are handled with static lane slices of
    # the already-projected activations (only the score/context step, where the
    # contraction depth is dh by definition). Softmax math stays in f32 with an
    # exact denominator so attention rows sum to 1.
    ctx_rows = []
    for b in range(bb):                                 # static (bb is small)
        rq = slice(b * T, (b + 1) * T)
        rk = slice(b * S, (b + 1) * S)
        head_ctx = []
        for h in range(nhead):                          # static
            cols = slice(h * dh, (h + 1) * dh)
            qh = qc[rq, cols]                           # (T, dh)
            kh = kc[rk, cols]                           # (S, dh)
            vh = vc[rk, cols]                           # (S, dh)
            # A @ B^T form: rhs contracts on its last dim -> no per-head transpose.
            s = jax.lax.dot_general(qh, kh, (((1,), (1,)), ((), ())),
                                    preferred_element_type=f32)   # (T, S)
            s = s - jnp.max(s, axis=-1, keepdims=True)
            p = jnp.exp(s)
            p = p / jnp.sum(p, axis=-1, keepdims=True)             # exact softmax
            head_ctx.append(
                jnp.dot(p.astype(cdt), vh, preferred_element_type=f32))  # (T, dh)
        ctx_rows.append(jnp.concatenate(head_ctx, axis=-1))        # (T, D) head-major
    ctx = jnp.concatenate(ctx_rows, axis=0) if bb > 1 else ctx_rows[0]  # (rows, D)

    # Fused head merge + out-projection: one (rows, D) @ (D, D) matmul (K = D).
    attn_out = jnp.dot(ctx.astype(cdt), wo_ref[...],
                       preferred_element_type=f32) + bo_ref[...]

    # residual + norm2 (dropout2 == identity in eval); residual stream kept in f32.
    resid = tgt_ref[...].reshape(bb * T, D).astype(f32)
    x = _layer_norm(resid + attn_out, g2_ref[...], be2_ref[...])

    # FFN: linear1 -> relu -> linear2 (dropout == identity).
    # TODO(synk): K-tile over dim_feedforward for production FF on v7x.
    h1 = jnp.dot(x.astype(cdt), w1_ref[...], preferred_element_type=f32) + b1_ref[...]
    h1 = jnp.maximum(h1, 0.0)
    ff = jnp.dot(h1.astype(cdt), w2_ref[...], preferred_element_type=f32) + b2_ref[...]

    # residual + norm3 (dropout3 == identity).
    y = _layer_norm(x + ff, g3_ref[...], be3_ref[...])
    out_ref[...] = y.reshape(bb, T, D).astype(out_ref.dtype)


def _vmem_capacity_bytes():
    # Capability query, not a compile probe: falls back to 128 MiB (v5e/v6e) when
    # the device can't be queried (e.g. interpret mode / CPU emulation).
    try:
        return int(pltpu.get_tpu_info().vmem_capacity_bytes)
    except Exception:
        return 128 << 20


def _vmem_limit_bytes(Bb, T, S, D, FF, act_bytes, w_bytes):
    rows_q, rows_k = Bb * T, Bb * S
    weights = (4 * D * D + 2 * D * FF) * w_bytes + (9 * D + FF) * 4  # + f32 bias/LN
    blocks = (2 * rows_q * D + 2 * rows_k * D + rows_q * D) * act_bytes
    work = (rows_q * D + 2 * rows_k * D          # q / k / v projections (f32)
            + Bb * T * S + rows_q * D            # per-head scores + merged context
            + rows_q * FF + 6 * rows_q * D) * 4  # ffn hidden + temporaries
    need = 2 * blocks + weights + work + (4 << 20)   # seq blocks double-buffered
    cap = _vmem_capacity_bytes() - (8 << 20)         # headroom for Mosaic scratch
    return int(max(16 << 20, min(max(need, 32 << 20), cap)))


def _pick_block_b(B, T, target_rows=128):
    """Batch elements per grid step: fill ~target_rows MXU rows, divide B, and keep
    >= 2 grid steps when possible so both v7x TensorCores get work."""
    bb = max(1, min(B, pl.cdiv(target_rows, T)))
    while B % bb:
        bb -= 1
    if bb == B and B > 1:
        bb = B // 2
        while B % bb:
            bb -= 1
    return max(1, bb)


def transformer_decoder_layer(tgt, memory, query_pos, pos, params, *, nhead,
                              compute_dtype=None):
    """Eval-mode forward of TransformerDecoderLayer (use_self_attn=False).

    compute_dtype selects the matmul-operand dtype (e.g. jnp.bfloat16 for 2x MXU
    throughput and halved DMA bytes); accumulation / LayerNorm / softmax stay f32.
    """
    B, T, D = tgt.shape
    S = memory.shape[1]
    FF = params["w1"].shape[1]
    assert D % nhead == 0
    dh = D // nhead
    scale = 1.0 / math.sqrt(dh)
    cdt = jnp.dtype(compute_dtype) if compute_dtype is not None else tgt.dtype
    f32 = jnp.float32

    # --- trace-time weight prep (free for the kernel) -------------------------
    wq = (params["wq"] * scale).astype(cdt)          # fold softmax scale into Wq
    bq = (params["bq"] * scale).astype(f32)          # ... and into bq
    wk = params["wk"].astype(cdt)
    wv = params["wv"].astype(cdt)
    wo = params["wo"].astype(cdt)
    w1 = params["w1"].astype(cdt)
    w2 = params["w2"].astype(cdt)
    bk = params["bk"].astype(f32)
    bv = params["bv"].astype(f32)
    bo = params["bo"].astype(f32)
    b1 = params["b1"].astype(f32)
    b2 = params["b2"].astype(f32)
    g2, be2 = params["g2"].astype(f32), params["be2"].astype(f32)
    g3, be3 = params["g3"].astype(f32), params["be3"].astype(f32)

    seqs = tuple(a.astype(cdt) for a in (tgt, memory, query_pos, pos))
    weights = (wq, bq, wk, bk, wv, bv, wo, bo, g2, be2, w1, b1, w2, b2, g3, be3)

    Bb = _pick_block_b(B, T)
    grid = (B // Bb,)

    def seq_spec(L):
        return pl.BlockSpec((Bb, L, D), lambda i: (i, 0, 0))

    def wspec(a):
        nd = a.ndim
        # grid-invariant block: constant index_map => fetched once, no re-DMA.
        return pl.BlockSpec(a.shape, lambda i, _nd=nd: (0,) * _nd)

    kernel = functools.partial(decoder_layer_kernel, nhead=nhead)
    call = pl.pallas_call(
        kernel,
        out_shape=jax.ShapeDtypeStruct((B, T, D), tgt.dtype),
        grid_spec=pltpu.PrefetchScalarGridSpec(
            num_scalar_prefetch=0,
            grid=grid,
            in_specs=[seq_spec(T), seq_spec(S), seq_spec(T), seq_spec(S)]
                     + [wspec(w) for w in weights],
            out_specs=pl.BlockSpec((Bb, T, D), lambda i: (i, 0, 0)),
        ),
        compiler_params=pltpu.CompilerParams(
            dimension_semantics=("parallel",),
            vmem_limit_bytes=_vmem_limit_bytes(
                Bb, T, S, D, FF, jnp.dtype(cdt).itemsize, jnp.dtype(cdt).itemsize),
        ),
    )
    # No block_until_ready here: successive layers' weight DMA / compute overlap.
    return call(*seqs, *weights)


def reference_jax(tgt, memory, query_pos, pos, params, *, nhead):
    """Pure-JAX reference mirroring the PyTorch forward (eval mode)."""
    q_in = tgt + query_pos
    k_in = memory + pos
    Q = q_in @ params["wq"] + params["bq"]
    K = k_in @ params["wk"] + params["bk"]
    V = memory @ params["wv"] + params["bv"]
    B, T, D = Q.shape
    S = K.shape[1]
    dh = D // nhead
    Qh = Q.reshape(B, T, nhead, dh).transpose(0, 2, 1, 3) / math.sqrt(dh)
    Kh = K.reshape(B, S, nhead, dh).transpose(0, 2, 1, 3)
    Vh = V.reshape(B, S, nhead, dh).transpose(0, 2, 1, 3)
    scores = jnp.einsum("bhtd,bhsd->bhts", Qh, Kh)
    p = jax.nn.softmax(scores, axis=-1)
    attn = jnp.einsum("bhts,bhsd->bhtd", p, Vh).transpose(0, 2, 1, 3).reshape(B, T, D)
    attn_out = attn @ params["wo"] + params["bo"]

    def ln(x, g, b, eps=1e-5):
        mu = x.mean(-1, keepdims=True)
        var = ((x - mu) ** 2).mean(-1, keepdims=True)
        return (x - mu) / jnp.sqrt(var + eps) * g + b

    x = ln(tgt + attn_out, params["g2"], params["be2"])
    ff = jnp.maximum(x @ params["w1"] + params["b1"], 0.0) @ params["w2"] + params["b2"]
    return ln(x + ff, params["g3"], params["be3"])


if __name__ == "__main__":
    # small but lane-dense demo shapes: d_model=128 keeps output stores unmasked.
    B, T, S, D, H, FF = 2, 8, 16, 128, 4, 256

    key = jax.random.PRNGKey(0)
    ks = jax.random.split(key, 16)
    sc = 0.1

    params = {
        # attention in/out projections, pre-transposed for x @ W
        "wq": sc * jax.random.normal(ks[0], (D, D), jnp.float32),
        "bq": sc * jax.random.normal(ks[1], (1, D), jnp.float32),
        "wk": sc * jax.random.normal(ks[2], (D, D), jnp.float32),
        "bk": sc * jax.random.normal(ks[3], (1, D), jnp.float32),
        "wv": sc * jax.random.normal(ks[4], (D, D), jnp.float32),
        "bv": sc * jax.random.normal(ks[5], (1, D), jnp.float32),
        "wo": sc * jax.random.normal(ks[6], (D, D), jnp.float32),
        "bo": sc * jax.random.normal(ks[7], (1, D), jnp.float32),
        # norm2 / norm3
        "g2": jnp.ones((1, D), jnp.float32),
        "be2": jnp.zeros((1, D), jnp.float32),
        "g3": jnp.ones((1, D), jnp.float32),
        "be3": jnp.zeros((1, D), jnp.float32),
        # FFN
        "w1": sc * jax.random.normal(ks[8], (D, FF), jnp.float32),
        "b1": sc * jax.random.normal(ks[9], (1, FF), jnp.float32),
        "w2": sc * jax.random.normal(ks[10], (FF, D), jnp.float32),
        "b2": sc * jax.random.normal(ks[11], (1, D), jnp.float32),
    }

    tgt = jax.random.normal(ks[12], (B, T, D), jnp.float32)
    memory = jax.random.normal(ks[13], (B, S, D), jnp.float32)
    query_pos = jax.random.normal(ks[14], (B, T, D), jnp.float32)
    pos = jax.random.normal(ks[15], (B, S, D), jnp.float32)

    ref = reference_jax(tgt, memory, query_pos, pos, params, nhead=H)

    # f32 path: exact softmax, f32 matmuls -> tight tolerance vs the f32 reference.
    out = transformer_decoder_layer(tgt, memory, query_pos, pos, params, nhead=H)
    out = jax.block_until_ready(out)
    assert out.shape == (B, T, D)
    assert jnp.allclose(out, ref, atol=2e-3, rtol=2e-3), "f32 mismatch vs JAX reference"

    # bf16 matmul-operand path (production setting): f32 accumulation and f32
    # LayerNorm/softmax; loose tolerance only reflects bf16 operand rounding.
    out_bf16 = transformer_decoder_layer(tgt, memory, query_pos, pos, params,
                                         nhead=H, compute_dtype=jnp.bfloat16)
    out_bf16 = jax.block_until_ready(out_bf16)
    assert jnp.allclose(out_bf16.astype(jnp.float32), ref, atol=1e-1, rtol=1e-1), \
        "bf16 path mismatch vs JAX reference"

    print("KERNEL_OK")
</pallas_src>

<mosaic_0001>
module attributes {stable_mosaic.version = 11 : i64} {
  func.func @decoder_layer_kernel(%arg0: i32, %arg1: memref<1x8x128xf32, #tpu.memory_space<vmem>>, %arg2: memref<1x16x128xf32, #tpu.memory_space<vmem>>, %arg3: memref<1x8x128xf32, #tpu.memory_space<vmem>>, %arg4: memref<1x16x128xf32, #tpu.memory_space<vmem>>, %arg5: memref<128x128xf32, #tpu.memory_space<vmem>>, %arg6: memref<1x128xf32, #tpu.memory_space<vmem>>, %arg7: memref<128x128xf32, #tpu.memory_space<vmem>>, %arg8: memref<1x128xf32, #tpu.memory_space<vmem>>, %arg9: memref<128x128xf32, #tpu.memory_space<vmem>>, %arg10: memref<1x128xf32, #tpu.memory_space<vmem>>, %arg11: memref<128x128xf32, #tpu.memory_space<vmem>>, %arg12: memref<1x128xf32, #tpu.memory_space<vmem>>, %arg13: memref<1x128xf32, #tpu.memory_space<vmem>>, %arg14: memref<1x128xf32, #tpu.memory_space<vmem>>, %arg15: memref<128x256xf32, #tpu.memory_space<vmem>>, %arg16: memref<1x256xf32, #tpu.memory_space<vmem>>, %arg17: memref<256x128xf32, #tpu.memory_space<vmem>>, %arg18: memref<1x128xf32, #tpu.memory_space<vmem>>, %arg19: memref<1x128xf32, #tpu.memory_space<vmem>>, %arg20: memref<1x128xf32, #tpu.memory_space<vmem>>, %arg21: memref<1x8x128xf32, #tpu.memory_space<vmem>>) attributes {dimension_semantics = [#tpu.dimension_semantics<parallel>], iteration_bounds = array<i64: 2>, scalar_prefetch = 0 : i64, scratch_operands = 0 : i64, tpu.core_type = #tpu.core_type<tc>, window_params = [{transform_indices = @transform_0, window_bounds = array<i64: 1, 8, 128>}, {transform_indices = @transform_1, window_bounds = array<i64: 1, 16, 128>}, {transform_indices = @transform_2, window_bounds = array<i64: 1, 8, 128>}, {transform_indices = @transform_3, window_bounds = array<i64: 1, 16, 128>}, {pipeline_mode = #tpu.pipeline_mode<synchronous>, transform_indices = @transform_4, window_bounds = array<i64: 128, 128>}, {pipeline_mode = #tpu.pipeline_mode<synchronous>, transform_indices = @transform_5, window_bounds = array<i64: 1, 128>}, {pipeline_mode = #tpu.pipeline_mode<synchronous>, transform_indices = @transform_6, window_bounds = array<i64: 128, 128>}, {pipeline_mode = #tpu.pipeline_mode<synchronous>, transform_indices = @transform_7, window_bounds = array<i64: 1, 128>}, {pipeline_mode = #tpu.pipeline_mode<synchronous>, transform_indices = @transform_8, window_bounds = array<i64: 128, 128>}, {pipeline_mode = #tpu.pipeline_mode<synchronous>, transform_indices = @transform_9, window_bounds = array<i64: 1, 128>}, {pipeline_mode = #tpu.pipeline_mode<synchronous>, transform_indices = @transform_10, window_bounds = array<i64: 128, 128>}, {pipeline_mode = #tpu.pipeline_mode<synchronous>, transform_indices = @transform_11, window_bounds = array<i64: 1, 128>}, {pipeline_mode = #tpu.pipeline_mode<synchronous>, transform_indices = @transform_12, window_bounds = array<i64: 1, 128>}, {pipeline_mode = #tpu.pipeline_mode<synchronous>, transform_indices = @transform_13, window_bounds = array<i64: 1, 128>}, {pipeline_mode = #tpu.pipeline_mode<synchronous>, transform_indices = @transform_14, window_bounds = array<i64: 128, 256>}, {pipeline_mode = #tpu.pipeline_mode<synchronous>, transform_indices = @transform_15, window_bounds = array<i64: 1, 256>}, {pipeline_mode = #tpu.pipeline_mode<synchronous>, transform_indices = @transform_16, window_bounds = array<i64: 256, 128>}, {pipeline_mode = #tpu.pipeline_mode<synchronous>, transform_indices = @transform_17, window_bounds = array<i64: 1, 128>}, {pipeline_mode = #tpu.pipeline_mode<synchronous>, transform_indices = @transform_18, window_bounds = array<i64: 1, 128>}, {pipeline_mode = #tpu.pipeline_mode<synchronous>, transform_indices = @transform_19, window_bounds = array<i64: 1, 128>}, {transform_indices = @transform_20, window_bounds = array<i64: 1, 8, 128>}]} {
    %c0 = arith.constant 0 : index
    %c0_0 = arith.constant 0 : index
    %c0_1 = arith.constant 0 : index
    %0 = vector.load %arg1[%c0, %c0_0, %c0_1] : memref<1x8x128xf32, #tpu.memory_space<vmem>>, vector<1x8x128xf32>
    %c0_2 = arith.constant 0 : index
    %c0_3 = arith.constant 0 : index
    %c0_4 = arith.constant 0 : index
    %1 = vector.load %arg3[%c0_2, %c0_3, %c0_4] : memref<1x8x128xf32, #tpu.memory_space<vmem>>, vector<1x8x128xf32>
    %2 = arith.addf %0, %1 : vector<1x8x128xf32>
    %3 = vector.shape_cast %2 : vector<1x8x128xf32> to vector<8x128xf32>
    %c0_5 = arith.constant 0 : index
    %c0_6 = arith.constant 0 : index
    %c0_7 = arith.constant 0 : index
    %4 = vector.load %arg2[%c0_5, %c0_6, %c0_7] : memref<1x16x128xf32, #tpu.memory_space<vmem>>, vector<1x16x128xf32>
    %c0_8 = arith.constant 0 : index
    %c0_9 = arith.constant 0 : index
    %c0_10 = arith.constant 0 : index
    %5 = vector.load %arg4[%c0_8, %c0_9, %c0_10] : memref<1x16x128xf32, #tpu.memory_space<vmem>>, vector<1x16x128xf32>
    %6 = arith.addf %4, %5 : vector<1x16x128xf32>
    %7 = vector.shape_cast %6 : vector<1x16x128xf32> to vector<16x128xf32>
    %c0_11 = arith.constant 0 : index
    %c0_12 = arith.constant 0 : index
    %c0_13 = arith.constant 0 : index
    %8 = vector.load %arg2[%c0_11, %c0_12, %c0_13] : memref<1x16x128xf32, #tpu.memory_space<vmem>>, vector<1x16x128xf32>
    %9 = vector.shape_cast %8 : vector<1x16x128xf32> to vector<16x128xf32>
    %c0_14 = arith.constant 0 : index
    %c0_15 = arith.constant 0 : index
    %10 = vector.load %arg5[%c0_14, %c0_15] : memref<128x128xf32, #tpu.memory_space<vmem>>, vector<128x128xf32>
    %cst = arith.constant dense<0.000000e+00> : vector<8x128xf32>
    %11 = tpu.matmul %3, %10, %cst {dimension_numbers = #tpu.dot_dimension_numbers<[1], [0], [0], [1], [0, 0, 1, 1], [], []>} : vector<8x128xf32>, vector<128x128xf32>, vector<8x128xf32> -> vector<8x128xf32>
    %c0_16 = arith.constant 0 : index
    %c0_17 = arith.constant 0 : index
    %12 = vector.load %arg6[%c0_16, %c0_17] : memref<1x128xf32, #tpu.memory_space<vmem>>, vector<1x128xf32>
    %13 = vector.broadcast %12 : vector<1x128xf32> to vector<8x128xf32>
    %14 = arith.addf %11, %13 : vector<8x128xf32>
    %c0_18 = arith.constant 0 : index
    %c0_19 = arith.constant 0 : index
    %15 = vector.load %arg7[%c0_18, %c0_19] : memref<128x128xf32, #tpu.memory_space<vmem>>, vector<128x128xf32>
    %cst_20 = arith.constant dense<0.000000e+00> : vector<16x128xf32>
    %16 = tpu.matmul %7, %15, %cst_20 {dimension_numbers = #tpu.dot_dimension_numbers<[1], [0], [0], [1], [0, 0, 1, 1], [], []>} : vector<16x128xf32>, vector<128x128xf32>, vector<16x128xf32> -> vector<16x128xf32>
    %c0_21 = arith.constant 0 : index
    %c0_22 = arith.constant 0 : index
    %17 = vector.load %arg8[%c0_21, %c0_22] : memref<1x128xf32, #tpu.memory_space<vmem>>, vector<1x128xf32>
    %18 = vector.broadcast %17 : vector<1x128xf32> to vector<16x128xf32>
    %19 = arith.addf %16, %18 : vector<16x128xf32>
    %c0_23 = arith.constant 0 : index
    %c0_24 = arith.constant 0 : index
    %20 = vector.load %arg9[%c0_23, %c0_24] : memref<128x128xf32, #tpu.memory_space<vmem>>, vector<128x128xf32>
    %cst_25 = arith.constant dense<0.000000e+00> : vector<16x128xf32>
    %21 = tpu.matmul %9, %20, %cst_25 {dimension_numbers = #tpu.dot_dimension_numbers<[1], [0], [0], [1], [0, 0, 1, 1], [], []>} : vector<16x128xf32>, vector<128x128xf32>, vector<16x128xf32> -> vector<16x128xf32>
    %c0_26 = arith.constant 0 : index
    %c0_27 = arith.constant 0 : index
    %22 = vector.load %arg10[%c0_26, %c0_27] : memref<1x128xf32, #tpu.memory_space<vmem>>, vector<1x128xf32>
    %23 = vector.broadcast %22 : vector<1x128xf32> to vector<16x128xf32>
    %24 = arith.addf %21, %23 : vector<16x128xf32>
    %25 = vector.extract_strided_slice %14 {offsets = [0, 0], sizes = [8, 32], strides = [1, 1]} : vector<8x128xf32> to vector<8x32xf32>
    %26 = vector.extract_strided_slice %19 {offsets = [0, 0], sizes = [16, 32], strides = [1, 1]} : vector<16x128xf32> to vector<16x32xf32>
    %27 = vector.extract_strided_slice %24 {offsets = [0, 0], sizes = [16, 32], strides = [1, 1]} : vector<16x128xf32> to vector<16x32xf32>
    %cst_28 = arith.constant dense<0.000000e+00> : vector<8x16xf32>
    %28 = tpu.matmul %25, %26, %cst_28 {dimension_numbers = #tpu.dot_dimension_numbers<[1], [1], [0], [0], [0, 0, 1, 0], [], []>} : vector<8x32xf32>, vector<16x32xf32>, vector<8x16xf32> -> vector<8x16xf32>
    %cst_29 = arith.constant dense<0xFF800000> : vector<8xf32>
    %29 = vector.multi_reduction <maximumf>, %28, %cst_29 [1] : vector<8x16xf32> to vector<8xf32>
    %30 = vector.shape_cast %29 : vector<8xf32> to vector<8x1xf32>
    %31 = vector.broadcast %30 : vector<8x1xf32> to vector<8x16xf32>
    %32 = arith.subf %28, %31 : vector<8x16xf32>
    %33 = math.exp %32 : vector<8x16xf32>
    %cst_30 = arith.constant dense<0.000000e+00> : vector<8xf32>
    %34 = vector.multi_reduction <add>, %33, %cst_30 [1] : vector<8x16xf32> to vector<8xf32>
    %35 = vector.shape_cast %34 : vector<8xf32> to vector<8x1xf32>
    %36 = vector.broadcast %35 : vector<8x1xf32> to vector<8x16xf32>
    %37 = arith.divf %33, %36 : vector<8x16xf32>
    %cst_31 = arith.constant dense<0.000000e+00> : vector<8x32xf32>
    %38 = tpu.matmul %37, %27, %cst_31 {dimension_numbers = #tpu.dot_dimension_numbers<[1], [0], [0], [1], [0, 0, 1, 1], [], []>} : vector<8x16xf32>, vector<16x32xf32>, vector<8x32xf32> -> vector<8x32xf32>
    %39 = vector.extract_strided_slice %14 {offsets = [0, 32], sizes = [8, 32], strides = [1, 1]} : vector<8x128xf32> to vector<8x32xf32>
    %40 = vector.extract_strided_slice %19 {offsets = [0, 32], sizes = [16, 32], strides = [1, 1]} : vector<16x128xf32> to vector<16x32xf32>
    %41 = vector.extract_strided_slice %24 {offsets = [0, 32], sizes = [16, 32], strides = [1, 1]} : vector<16x128xf32> to vector<16x32xf32>
    %cst_32 = arith.constant dense<0.000000e+00> : vector<8x16xf32>
    %42 = tpu.matmul %39, %40, %cst_32 {dimension_numbers = #tpu.dot_dimension_numbers<[1], [1], [0], [0], [0, 0, 1, 0], [], []>} : vector<8x32xf32>, vector<16x32xf32>, vector<8x16xf32> -> vector<8x16xf32>
    %cst_33 = arith.constant dense<0xFF800000> : vector<8xf32>
    %43 = vector.multi_reduction <maximumf>, %42, %cst_33 [1] : vector<8x16xf32> to vector<8xf32>
    %44 = vector.shape_cast %43 : vector<8xf32> to vector<8x1xf32>
    %45 = vector.broadcast %44 : vector<8x1xf32> to vector<8x16xf32>
    %46 = arith.subf %42, %45 : vector<8x16xf32>
    %47 = math.exp %46 : vector<8x16xf32>
    %cst_34 = arith.constant dense<0.000000e+00> : vector<8xf32>
    %48 = vector.multi_reduction <add>, %47, %cst_34 [1] : vector<8x16xf32> to vector<8xf32>
    %49 = vector.shape_cast %48 : vector<8xf32> to vector<8x1xf32>
    %50 = vector.broadcast %49 : vector<8x1xf32> to vector<8x16xf32>
    %51 = arith.divf %47, %50 : vector<8x16xf32>
    %cst_35 = arith.constant dense<0.000000e+00> : vector<8x32xf32>
    %52 = tpu.matmul %51, %41, %cst_35 {dimension_numbers = #tpu.dot_dimension_numbers<[1], [0], [0], [1], [0, 0, 1, 1], [], []>} : vector<8x16xf32>, vector<16x32xf32>, vector<8x32xf32> -> vector<8x32xf32>
    %53 = vector.extract_strided_slice %14 {offsets = [0, 64], sizes = [8, 32], strides = [1, 1]} : vector<8x128xf32> to vector<8x32xf32>
    %54 = vector.extract_strided_slice %19 {offsets = [0, 64], sizes = [16, 32], strides = [1, 1]} : vector<16x128xf32> to vector<16x32xf32>
    %55 = vector.extract_strided_slice %24 {offsets = [0, 64], sizes = [16, 32], strides = [1, 1]} : vector<16x128xf32> to vector<16x32xf32>
    %cst_36 = arith.constant dense<0.000000e+00> : vector<8x16xf32>
    %56 = tpu.matmul %53, %54, %cst_36 {dimension_numbers = #tpu.dot_dimension_numbers<[1], [1], [0], [0], [0, 0, 1, 0], [], []>} : vector<8x32xf32>, vector<16x32xf32>, vector<8x16xf32> -> vector<8x16xf32>
    %cst_37 = arith.constant dense<0xFF800000> : vector<8xf32>
    %57 = vector.multi_reduction <maximumf>, %56, %cst_37 [1] : vector<8x16xf32> to vector<8xf32>
    %58 = vector.shape_cast %57 : vector<8xf32> to vector<8x1xf32>
    %59 = vector.broadcast %58 : vector<8x1xf32> to vector<8x16xf32>
    %60 = arith.subf %56, %59 : vector<8x16xf32>
    %61 = math.exp %60 : vector<8x16xf32>
    %cst_38 = arith.constant dense<0.000000e+00> : vector<8xf32>
    %62 = vector.multi_reduction <add>, %61, %cst_38 [1] : vector<8x16xf32> to vector<8xf32>
    %63 = vector.shape_cast %62 : vector<8xf32> to vector<8x1xf32>
    %64 = vector.broadcast %63 : vector<8x1xf32> to vector<8x16xf32>
    %65 = arith.divf %61, %64 : vector<8x16xf32>
    %cst_39 = arith.constant dense<0.000000e+00> : vector<8x32xf32>
    %66 = tpu.matmul %65, %55, %cst_39 {dimension_numbers = #tpu.dot_dimension_numbers<[1], [0], [0], [1], [0, 0, 1, 1], [], []>} : vector<8x16xf32>, vector<16x32xf32>, vector<8x32xf32> -> vector<8x32xf32>
    %67 = vector.extract_strided_slice %14 {offsets = [0, 96], sizes = [8, 32], strides = [1, 1]} : vector<8x128xf32> to vector<8x32xf32>
    %68 = vector.extract_strided_slice %19 {offsets = [0, 96], sizes = [16, 32], strides = [1, 1]} : vector<16x128xf32> to vector<16x32xf32>
    %69 = vector.extract_strided_slice %24 {offsets = [0, 96], sizes = [16, 32], strides = [1, 1]} : vector<16x128xf32> to vector<16x32xf32>
    %cst_40 = arith.constant dense<0.000000e+00> : vector<8x16xf32>
    %70 = tpu.matmul %67, %68, %cst_40 {dimension_numbers = #tpu.dot_dimension_numbers<[1], [1], [0], [0], [0, 0, 1, 0], [], []>} : vector<8x32xf32>, vector<16x32xf32>, vector<8x16xf32> -> vector<8x16xf32>
    %cst_41 = arith.constant dense<0xFF800000> : vector<8xf32>
    %71 = vector.multi_reduction <maximumf>, %70, %cst_41 [1] : vector<8x16xf32> to vector<8xf32>
    %72 = vector.shape_cast %71 : vector<8xf32> to vector<8x1xf32>
    %73 = vector.broadcast %72 : vector<8x1xf32> to vector<8x16xf32>
    %74 = arith.subf %70, %73 : vector<8x16xf32>
    %75 = math.exp %74 : vector<8x16xf32>
    %cst_42 = arith.constant dense<0.000000e+00> : vector<8xf32>
    %76 = vector.multi_reduction <add>, %75, %cst_42 [1] : vector<8x16xf32> to vector<8xf32>
    %77 = vector.shape_cast %76 : vector<8xf32> to vector<8x1xf32>
    %78 = vector.broadcast %77 : vector<8x1xf32> to vector<8x16xf32>
    %79 = arith.divf %75, %78 : vector<8x16xf32>
    %cst_43 = arith.constant dense<0.000000e+00> : vector<8x32xf32>
    %80 = tpu.matmul %79, %69, %cst_43 {dimension_numbers = #tpu.dot_dimension_numbers<[1], [0], [0], [1], [0, 0, 1, 1], [], []>} : vector<8x16xf32>, vector<16x32xf32>, vector<8x32xf32> -> vector<8x32xf32>
    %81 = tpu.concatenate %38, %52, %66, %80 in 1 : vector<8x32xf32>, vector<8x32xf32>, vector<8x32xf32>, vector<8x32xf32> -> vector<8x128xf32>
    %c0_44 = arith.constant 0 : index
    %c0_45 = arith.constant 0 : index
    %82 = vector.load %arg11[%c0_44, %c0_45] : memref<128x128xf32, #tpu.memory_space<vmem>>, vector<128x128xf32>
    %cst_46 = arith.constant dense<0.000000e+00> : vector<8x128xf32>
    %83 = tpu.matmul %81, %82, %cst_46 {dimension_numbers = #tpu.dot_dimension_numbers<[1], [0], [0], [1], [0, 0, 1, 1], [], []>} : vector<8x128xf32>, vector<128x128xf32>, vector<8x128xf32> -> vector<8x128xf32>
    %c0_47 = arith.constant 0 : index
    %c0_48 = arith.constant 0 : index
    %84 = vector.load %arg12[%c0_47, %c0_48] : memref<1x128xf32, #tpu.memory_space<vmem>>, vector<1x128xf32>
    %85 = vector.broadcast %84 : vector<1x128xf32> to vector<8x128xf32>
    %86 = arith.addf %83, %85 : vector<8x128xf32>
    %c0_49 = arith.constant 0 : index
    %c0_50 = arith.constant 0 : index
    %c0_51 = arith.constant 0 : index
    %87 = vector.load %arg1[%c0_49, %c0_50, %c0_51] : memref<1x8x128xf32, #tpu.memory_space<vmem>>, vector<1x8x128xf32>
    %88 = vector.shape_cast %87 : vector<1x8x128xf32> to vector<8x128xf32>
    %89 = arith.addf %88, %86 : vector<8x128xf32>
    %c0_52 = arith.constant 0 : index
    %c0_53 = arith.constant 0 : index
    %90 = vector.load %arg13[%c0_52, %c0_53] : memref<1x128xf32, #tpu.memory_space<vmem>>, vector<1x128xf32>
    %c0_54 = arith.constant 0 : index
    %c0_55 = arith.constant 0 : index
    %91 = vector.load %arg14[%c0_54, %c0_55] : memref<1x128xf32, #tpu.memory_space<vmem>>, vector<1x128xf32>
    %cst_56 = arith.constant dense<0.000000e+00> : vector<8xf32>
    %92 = vector.multi_reduction <add>, %89, %cst_56 [1] : vector<8x128xf32> to vector<8xf32>
    %93 = vector.shape_cast %92 : vector<8xf32> to vector<8x1xf32>
    %cst_57 = arith.constant 1.280000e+02 : f32
    %94 = vector.broadcast %cst_57 : f32 to vector<8x1xf32>
    %95 = arith.divf %93, %94 : vector<8x1xf32>
    %96 = vector.broadcast %95 : vector<8x1xf32> to vector<8x128xf32>
    %97 = arith.subf %89, %96 : vector<8x128xf32>
    %98 = arith.mulf %97, %97 : vector<8x128xf32>
    %cst_58 = arith.constant dense<0.000000e+00> : vector<8xf32>
    %99 = vector.multi_reduction <add>, %98, %cst_58 [1] : vector<8x128xf32> to vector<8xf32>
    %100 = vector.shape_cast %99 : vector<8xf32> to vector<8x1xf32>
    %cst_59 = arith.constant 1.280000e+02 : f32
    %101 = vector.broadcast %cst_59 : f32 to vector<8x1xf32>
    %102 = arith.divf %100, %101 : vector<8x1xf32>
    %cst_60 = arith.constant 9.99999974E-6 : f32
    %103 = vector.broadcast %cst_60 : f32 to vector<8x1xf32>
    %104 = arith.addf %102, %103 : vector<8x1xf32>
    %105 = math.rsqrt %104 : vector<8x1xf32>
    %106 = vector.broadcast %105 : vector<8x1xf32> to vector<8x128xf32>
    %107 = arith.mulf %97, %106 : vector<8x128xf32>
    %108 = vector.broadcast %90 : vector<1x128xf32> to vector<8x128xf32>
    %109 = arith.mulf %107, %108 : vector<8x128xf32>
    %110 = vector.broadcast %91 : vector<1x128xf32> to vector<8x128xf32>
    %111 = arith.addf %109, %110 : vector<8x128xf32>
    %c0_61 = arith.constant 0 : index
    %c0_62 = arith.constant 0 : index
    %112 = vector.load %arg15[%c0_61, %c0_62] : memref<128x256xf32, #tpu.memory_space<vmem>>, vector<128x256xf32>
    %cst_63 = arith.constant dense<0.000000e+00> : vector<8x256xf32>
    %113 = tpu.matmul %111, %112, %cst_63 {dimension_numbers = #tpu.dot_dimension_numbers<[1], [0], [0], [1], [0, 0, 1, 1], [], []>} : vector<8x128xf32>, vector<128x256xf32>, vector<8x256xf32> -> vector<8x256xf32>
    %c0_64 = arith.constant 0 : index
    %c0_65 = arith.constant 0 : index
    %114 = vector.load %arg16[%c0_64, %c0_65] : memref<1x256xf32, #tpu.memory_space<vmem>>, vector<1x256xf32>
    %115 = vector.broadcast %114 : vector<1x256xf32> to vector<8x256xf32>
    %116 = arith.addf %113, %115 : vector<8x256xf32>
    %cst_66 = arith.constant 0.000000e+00 : f32
    %117 = vector.broadcast %cst_66 : f32 to vector<8x256xf32>
    %118 = arith.maximumf %116, %117 : vector<8x256xf32>
    %c0_67 = arith.constant 0 : index
    %c0_68 = arith.constant 0 : index
    %119 = vector.load %arg17[%c0_67, %c0_68] : memref<256x128xf32, #tpu.memory_space<vmem>>, vector<256x128xf32>
    %cst_69 = arith.constant dense<0.000000e+00> : vector<8x128xf32>
    %120 = tpu.matmul %118, %119, %cst_69 {dimension_numbers = #tpu.dot_dimension_numbers<[1], [0], [0], [1], [0, 0, 1, 1], [], []>} : vector<8x256xf32>, vector<256x128xf32>, vector<8x128xf32> -> vector<8x128xf32>
    %c0_70 = arith.constant 0 : index
    %c0_71 = arith.constant 0 : index
    %121 = vector.load %arg18[%c0_70, %c0_71] : memref<1x128xf32, #tpu.memory_space<vmem>>, vector<1x128xf32>
    %122 = vector.broadcast %121 : vector<1x128xf32> to vector<8x128xf32>
    %123 = arith.addf %120, %122 : vector<8x128xf32>
    %124 = arith.addf %111, %123 : vector<8x128xf32>
    %c0_72 = arith.constant 0 : index
    %c0_73 = arith.constant 0 : index
    %125 = vector.load %arg19[%c0_72, %c0_73] : memref<1x128xf32, #tpu.memory_space<vmem>>, vector<1x128xf32>
    %c0_74 = arith.constant 0 : index
    %c0_75 = arith.constant 0 : index
    %126 = vector.load %arg20[%c0_74, %c0_75] : memref<1x128xf32, #tpu.memory_space<vmem>>, vector<1x128xf32>
    %cst_76 = arith.constant dense<0.000000e+00> : vector<8xf32>
    %127 = vector.multi_reduction <add>, %124, %cst_76 [1] : vector<8x128xf32> to vector<8xf32>
    %128 = vector.shape_cast %127 : vector<8xf32> to vector<8x1xf32>
    %cst_77 = arith.constant 1.280000e+02 : f32
    %129 = vector.broadcast %cst_77 : f32 to vector<8x1xf32>
    %130 = arith.divf %128, %129 : vector<8x1xf32>
    %131 = vector.broadcast %130 : vector<8x1xf32> to vector<8x128xf32>
    %132 = arith.subf %124, %131 : vector<8x128xf32>
    %133 = arith.mulf %132, %132 : vector<8x128xf32>
    %cst_78 = arith.constant dense<0.000000e+00> : vector<8xf32>
    %134 = vector.multi_reduction <add>, %133, %cst_78 [1] : vector<8x128xf32> to vector<8xf32>
    %135 = vector.shape_cast %134 : vector<8xf32> to vector<8x1xf32>
    %cst_79 = arith.constant 1.280000e+02 : f32
    %136 = vector.broadcast %cst_79 : f32 to vector<8x1xf32>
    %137 = arith.divf %135, %136 : vector<8x1xf32>
    %cst_80 = arith.constant 9.99999974E-6 : f32
    %138 = vector.broadcast %cst_80 : f32 to vector<8x1xf32>
    %139 = arith.addf %137, %138 : vector<8x1xf32>
    %140 = math.rsqrt %139 : vector<8x1xf32>
    %141 = vector.broadcast %140 : vector<8x1xf32> to vector<8x128xf32>
    %142 = arith.mulf %132, %141 : vector<8x128xf32>
    %143 = vector.broadcast %125 : vector<1x128xf32> to vector<8x128xf32>
    %144 = arith.mulf %142, %143 : vector<8x128xf32>
    %145 = vector.broadcast %126 : vector<1x128xf32> to vector<8x128xf32>
    %146 = arith.addf %144, %145 : vector<8x128xf32>
    %147 = vector.shape_cast %146 : vector<8x128xf32> to vector<1x8x128xf32>
    %c0_81 = arith.constant 0 : index
    %c0_82 = arith.constant 0 : index
    %c0_83 = arith.constant 0 : index
    %148 = vector.load %arg21[%c0_81, %c0_82, %c0_83] : memref<1x8x128xf32, #tpu.memory_space<vmem>>, vector<1x8x128xf32>
    tpu.vector_store %arg21[%c0_81, %c0_82, %c0_83], %147 {strides = array<i32>} : memref<1x8x128xf32, #tpu.memory_space<vmem>>, vector<1x8x128xf32>,
    return
  }
  func.func @transform_0(%arg0: i32) -> (i32, i32, i32) {
    %c0_i32 = arith.constant 0 : i32
    %c0_i32_0 = arith.constant 0 : i32
    %c0_i32_1 = arith.constant 0 : i32
    return %arg0, %c0_i32, %c0_i32_0 : i32, i32, i32
  }
  func.func @transform_1(%arg0: i32) -> (i32, i32, i32) {
    %c0_i32 = arith.constant 0 : i32
    %c0_i32_0 = arith.constant 0 : i32
    %c0_i32_1 = arith.constant 0 : i32
    return %arg0, %c0_i32, %c0_i32_0 : i32, i32, i32
  }
  func.func @transform_2(%arg0: i32) -> (i32, i32, i32) {
    %c0_i32 = arith.constant 0 : i32
    %c0_i32_0 = arith.constant 0 : i32
    %c0_i32_1 = arith.constant 0 : i32
    return %arg0, %c0_i32, %c0_i32_0 : i32, i32, i32
  }
  func.func @transform_3(%arg0: i32) -> (i32, i32, i32) {
    %c0_i32 = arith.constant 0 : i32
    %c0_i32_0 = arith.constant 0 : i32
    %c0_i32_1 = arith.constant 0 : i32
    return %arg0, %c0_i32, %c0_i32_0 : i32, i32, i32
  }
  func.func @transform_4(%arg0: i32) -> (i32, i32) {
    %c0_i32 = arith.constant 0 : i32
    %c0_i32_0 = arith.constant 0 : i32
    %c0_i32_1 = arith.constant 0 : i32
    return %c0_i32, %c0_i32_0 : i32, i32
  }
  func.func @transform_5(%arg0: i32) -> (i32, i32) {
    %c0_i32 = arith.constant 0 : i32
    %c0_i32_0 = arith.constant 0 : i32
    %c0_i32_1 = arith.constant 0 : i32
    return %c0_i32, %c0_i32_0 : i32, i32
  }
  func.func @transform_6(%arg0: i32) -> (i32, i32) {
    %c0_i32 = arith.constant 0 : i32
    %c0_i32_0 = arith.constant 0 : i32
    %c0_i32_1 = arith.constant 0 : i32
    return %c0_i32, %c0_i32_0 : i32, i32
  }
  func.func @transform_7(%arg0: i32) -> (i32, i32) {
    %c0_i32 = arith.constant 0 : i32
    %c0_i32_0 = arith.constant 0 : i32
    %c0_i32_1 = arith.constant 0 : i32
    return %c0_i32, %c0_i32_0 : i32, i32
  }
  func.func @transform_8(%arg0: i32) -> (i32, i32) {
    %c0_i32 = arith.constant 0 : i32
    %c0_i32_0 = arith.constant 0 : i32
    %c0_i32_1 = arith.constant 0 : i32
    return %c0_i32, %c0_i32_0 : i32, i32
  }
  func.func @transform_9(%arg0: i32) -> (i32, i32) {
    %c0_i32 = arith.constant 0 : i32
    %c0_i32_0 = arith.constant 0 : i32
    %c0_i32_1 = arith.constant 0 : i32
    return %c0_i32, %c0_i32_0 : i32, i32
  }
  func.func @transform_10(%arg0: i32) -> (i32, i32) {
    %c0_i32 = arith.constant 0 : i32
    %c0_i32_0 = arith.constant 0 : i32
    %c0_i32_1 = arith.constant 0 : i32
    return %c0_i32, %c0_i32_0 : i32, i32
  }
  func.func @transform_11(%arg0: i32) -> (i32, i32) {
    %c0_i32 = arith.constant 0 : i32
    %c0_i32_0 = arith.constant 0 : i32
    %c0_i32_1 = arith.constant 0 : i32
    return %c0_i32, %c0_i32_0 : i32, i32
  }
  func.func @transform_12(%arg0: i32) -> (i32, i32) {
    %c0_i32 = arith.constant 0 : i32
    %c0_i32_0 = arith.constant 0 : i32
    %c0_i32_1 = arith.constant 0 : i32
    return %c0_i32, %c0_i32_0 : i32, i32
  }
  func.func @transform_13(%arg0: i32) -> (i32, i32) {
    %c0_i32 = arith.constant 0 : i32
    %c0_i32_0 = arith.constant 0 : i32
    %c0_i32_1 = arith.constant 0 : i32
    return %c0_i32, %c0_i32_0 : i32, i32
  }
  func.func @transform_14(%arg0: i32) -> (i32, i32) {
    %c0_i32 = arith.constant 0 : i32
    %c0_i32_0 = arith.constant 0 : i32
    %c0_i32_1 = arith.constant 0 : i32
    return %c0_i32, %c0_i32_0 : i32, i32
  }
  func.func @transform_15(%arg0: i32) -> (i32, i32) {
    %c0_i32 = arith.constant 0 : i32
    %c0_i32_0 = arith.constant 0 : i32
    %c0_i32_1 = arith.constant 0 : i32
    return %c0_i32, %c0_i32_0 : i32, i32
  }
  func.func @transform_16(%arg0: i32) -> (i32, i32) {
    %c0_i32 = arith.constant 0 : i32
    %c0_i32_0 = arith.constant 0 : i32
    %c0_i32_1 = arith.constant 0 : i32
    return %c0_i32, %c0_i32_0 : i32, i32
  }
  func.func @transform_17(%arg0: i32) -> (i32, i32) {
    %c0_i32 = arith.constant 0 : i32
    %c0_i32_0 = arith.constant 0 : i32
    %c0_i32_1 = arith.constant 0 : i32
    return %c0_i32, %c0_i32_0 : i32, i32
  }
  func.func @transform_18(%arg0: i32) -> (i32, i32) {
    %c0_i32 = arith.constant 0 : i32
    %c0_i32_0 = arith.constant 0 : i32
    %c0_i32_1 = arith.constant 0 : i32
    return %c0_i32, %c0_i32_0 : i32, i32
  }
  func.func @transform_19(%arg0: i32) -> (i32, i32) {
    %c0_i32 = arith.constant 0 : i32
    %c0_i32_0 = arith.constant 0 : i32
    %c0_i32_1 = arith.constant 0 : i32
    return %c0_i32, %c0_i32_0 : i32, i32
  }
  func.func @transform_20(%arg0: i32) -> (i32, i32, i32) {
    %c0_i32 = arith.constant 0 : i32
    %c0_i32_0 = arith.constant 0 : i32
    %c0_i32_1 = arith.constant 0 : i32
    return %arg0, %c0_i32, %c0_i32_0 : i32, i32, i32
  }
}

</mosaic_0001>

<bundles_post_ra>
// kernel: tpu_custom_call.1
= control target key start
LH: loop header
LB: loop body
LE: loop exit
PB: predicated region body
PF: predicated region fallthrough
CT: control target
= control target key end

     0   :  { %s4340_s0 = inlined_call_operand.hbm [shape: f32[2,8,128], index: 0, kind: input, shape index: {}]   ;;  %s4341_s1 = inlined_call_operand.hbm [shape: f32[2,16,128], index: 1, kind: input, shape index: {}]   ;;  %s4342_s2 = inlined_call_operand.hbm [shape: f32[2,8,128], index: 2, kind: input, shape index: {}]   ;;  %s4343_s3 = inlined_call_operand.hbm [shape: f32[2,16,128], index: 3, kind: input, shape index: {}]   ;;  %s4344_s4 = inlined_call_operand.hbm [shape: f32[128,128], index: 4, kind: input, shape index: {}]   ;;  %s4345_s5 = inlined_call_operand.vmem [shape: f32[1,128], index: 5, kind: input, shape index: {}]   ;;  %s4346_s6 = inlined_call_operand.hbm [shape: f32[128,128], index: 6, kind: input, shape index: {}]   ;;  %s4347_s7 = inlined_call_operand.vmem [shape: f32[1,128], index: 7, kind: input, shape index: {}]   ;;  %s4348_s8 = inlined_call_operand.hbm [shape: f32[128,128], index: 8, kind: input, shape index: {}]   ;;  %s4349_s9 = inlined_call_operand.vmem [shape: f32[1,128], index: 9, kind: input, shape index: {}]   ;;  %s4350_s10 = inlined_call_operand.hbm [shape: f32[128,128], index: 10, kind: input, shape index: {}]   ;;  %s4351_s11 = inlined_call_operand.vmem [shape: f32[1,128], index: 11, kind: input, shape index: {}]   ;;  %s4352_s12 = inlined_call_operand.vmem [shape: f32[1,128], index: 12, kind: input, shape index: {}]   ;;  %s4353_s13 = inlined_call_operand.vmem [shape: f32[1,128], index: 13, kind: input, shape index: {}]   ;;  %s4354_s14 = inlined_call_operand.hbm [shape: f32[128,256], index: 14, kind: input, shape index: {}]   ;;  %s4355_s15 = inlined_call_operand.vmem [shape: f32[1,256], index: 15, kind: input, shape index: {}]   ;;  %s4356_s16 = inlined_call_operand.hbm [shape: f32[256,128], index: 16, kind: input, shape index: {}]   ;;  %s4357_s17 = inlined_call_operand.vmem [shape: f32[1,128], index: 17, kind: input, shape index: {}]   ;;  %s4358_s18 = inlined_call_operand.vmem [shape: f32[1,128], index: 18, kind: input, shape index: {}]   ;;  %s4359_s19 = inlined_call_operand.vmem [shape: f32[1,128], index: 19, kind: input, shape index: {}]   ;;  %s4360_s20 = inlined_call_operand.hbm [shape: f32[2,8,128], index: 20, kind: output, shape index: {}]  }
   0x1   :  { %4398 = sst [smem:[#allocation36_spill]] %s4340_s0 }
   0x2   :  { %4399 = sst [smem:[#allocation37_spill]] %s4341_s1 }
   0x3   :  { %4400 = sst [smem:[#allocation38_spill]] %s4342_s2 }
   0x4   :  { %4401 = sst [smem:[#allocation39_spill]] %s4343_s3 }
   0x5   :  { %4402 = sst [smem:[#allocation40_spill]] %s4344_s4 }
   0x6   :  { %4403 = sst [smem:[#allocation41_spill]] %s4345_s5 }
   0x7   :  { %4404 = sst [smem:[#allocation42_spill]] %s4346_s6 }
   0x8   :  { %4405 = sst [smem:[#allocation43_spill]] %s4347_s7 }
   0x9   :  { %4406 = sst [smem:[#allocation44_spill]] %s4348_s8 }
   0xa   :  { %4407 = sst [smem:[#allocation45_spill]] %s4349_s9 }
   0xb   :  { %4408 = sst [smem:[#allocation46_spill]] %s4350_s10 }
   0xc   :  { %4409 = sst [smem:[#allocation47_spill]] %s4351_s11 }
   0xd   :  { %4410 = sst [smem:[#allocation48_spill]] %s4352_s12 }
   0xe   :  { %4411 = sst [smem:[#allocation49_spill]] %s4353_s13 }
   0xf   :  { %4412 = sst [smem:[#allocation50_spill]] %s4355_s15 }
  0x10   :  { %4413 = sst [smem:[#allocation51_spill]] %s4357_s17 }
  0x11   :  { %4414 = sst [smem:[#allocation52_spill]] %s4358_s18 }
  0x12   :  { %4415 = sst [smem:[#allocation53_spill]] %s4359_s19 }
  0x13   :  { %4416 = sst [smem:[#allocation54_spill]] %s4360_s20 }
  0x14   :  { %25 = vsyncpa [#allocation3], 0 }
  0x15   :  { %27 = vsyncpa [#allocation3 + $0x1], 0 }
  0x16   :  { %28 = vsyncpa [#allocation6], 0 }
  0x17   :  { %30 = vsyncpa [#allocation6 + $0x1], 0 }
  0x18   :  { %31 = vsyncpa [#allocation9], 0 }
  0x19   :  { %33 = vsyncpa [#allocation9 + $0x1], 0 }
  0x1a   :  { %34 = vsyncpa [#allocation12], 0 }
  0x1b   :  { %35 = vsyncpa [#allocation15], 0 }
  0x1c   :  { %36 = vsyncpa [#allocation18], 0 }
  0x1d   :  { %37 = vsyncpa [#allocation4], 0 }
  0x1e   :  { %39 = vsyncpa [#allocation4 + $0x1], 0  ;;  %s3707_s1 = smov 0   ;;  %s3709_s22 = smov 0  }
  0x1f   :  { %s3711_s23 = smov 0   ;;  %s3713_s24 = smov 0  }
  0x20 LB: > { %4417 = sst [smem:[#allocation28_spill]] %s3567_s1  ;;  %s3581_s2 = smov [#allocation10]   ;;  %s3579_s24 = sphi %s3713_s24, %s4484_s24   ;;  %s3575_s23 = sphi %s3711_s23, %s4486_s23   ;;  %s3571_s22 = sphi %s3709_s22, %s4488_s22   ;;  %s3567_s1 = sphi %s3707_s1, %s4487_s1  }
  0x21   : > { %4418 = sst [smem:[#allocation29_spill]] %s3575_s23  ;;  %s528_s25 = sshll.u32 %s3581_s2, 4  ;;  %s3733_s25 = int_to_ptr.vmem [resolvable:$true] %s528_s25 }
  0x22   : > { %s3728_s3 = sadd.s32 4294967295, %s3579_s24   ;;  %p2429_p0 = scmp.ge.s32.totalorder %s3579_s24, 1 }
  0x23   : > { %4419 = sst [smem:[#allocation30_spill]] %s3728_s3  ;;  %p4376_p1 = scmp.eq.s32.totalorder %s3728_s3, 0 }
  0x24   : > { %p516_p2 = scmp.lt.s32.totalorder %s3579_s24, 3  ;;  %s3582_s27 = smov [#allocation11]  }
  0x25   : > { %s544_s28 = sshll.u32 %s3582_s27, 4  ;;  %s3583_s29 = smov [#allocation14]   ;;  %s3748_s28 = int_to_ptr.vmem [resolvable:$true] %s544_s28 }
  0x26   : > { %p3735_p3 = pnand %p2429_p0, %p516_p2  ;;  %s576_s30 = sshll.u32 %s3583_s29, 4  ;;  %s3750_s30 = int_to_ptr.vmem [resolvable:$true] %s576_s30 }
  0x27   : > { %s4422_s2 = sld [smem:[#allocation40_spill]] }
  0x28   : > { %s4420_s26 = scalar_select %p3735_p3, 1, 0 }
  0x29   : > { %p3053_p5 = pneg %p3735_p3 }
  0x2b   : > { %p3744_p6 = pnand %p3053_p5, %p4376_p1 }
  0x2d   : > { %s4421_s4 = scalar_select %p3744_p6, 1, 0 }
  0x2e   : > { %s3201_s20 = scalar_lea.hbm %s4422_s2, 2048  ;;  %p3760_p8 = pneg %p3744_p6 }
  0x2f   : > { %p3202_p7 = scmp.ne.s32.totalorder %s4422_s2, %s3201_s20  ;;  %p3208_p11 = scmp.lt.u32.totalorder %s3201_s20, %s4422_s2 }
  0x30   : > { %s4423_s27 = scalar_select %p3760_p8, 1, 0 }
  0x31   : > { %p3204_p9 = pnand %p3760_p8, %p3202_p7 }
  0x33   : > { %p3205_p10 = pneg %p3204_p9 }
  0x35   : > { %p3210_p12 = pnand %p3208_p11, %p3205_p10 }
  0x37   : > { %3213 = shalt.err (!%p3210_p12)
}
  0x38   : > { %s3214_s18 = scalar_lea.vmem %s3733_s25, 2048  ;;  %p3222_p5 = scmp.lt.s32.totalorder %s3733_s25, %s3733_s25 }
  0x39   : > { %p3215_p13 = scmp.ne.s32.totalorder %s3733_s25, %s3214_s18  ;;  %p3223_p4 = scmp.lt.s32.totalorder %s3214_s18, %s3214_s18 }
  0x3b   : > { %p3217_p0 = pnand %p3215_p13, %p3760_p8  ;;  %p3224_p7 = por %p3223_p4, %p3222_p5 }
  0x3d   : > { %p3218_p2 = pneg %p3217_p0 }
  0x3f   : > { %p3225_p9 = pnand %p3224_p7, %p3218_p2 }
  0x41   : > { %3228 = shalt.err (!%p3225_p9)
}
  0x42   : > { %s4368_s19 = smov 128   ;;  %s4370_s17 = smov 8  }
  0x43   : > { %3056 = dma.hbm_to_vmem [thread:$0]  (!%p3744_p6), %s4422_s2, 2048, %s3733_s25, [#allocation9], %s4368_s19, %s4368_s19, %s4370_s17  }
  0x44   : > { %s4424_s6 = sld [smem:[#allocation42_spill]] }
  0x4a   : > { %s3229_s18 = scalar_lea.hbm %s4424_s6, 2048 }
  0x4b   : > { %p3230_p4 = scmp.ne.s32.totalorder %s4424_s6, %s3229_s18  ;;  %p3236_p12 = scmp.lt.u32.totalorder %s3229_s18, %s4424_s6 }
  0x4d   : > { %p3232_p10 = pnand %p3230_p4, %p3760_p8 }
  0x4f   : > { %p3233_p11 = pneg %p3232_p10 }
  0x51   : > { %p3238_p13 = pnand %p3236_p12, %p3233_p11 }
  0x53   : > { %3241 = shalt.err (!%p3238_p13)
}
  0x54   : > { %s3242_s25 = scalar_lea.vmem %s3748_s28, 2048  ;;  %p3250_p7 = scmp.lt.s32.totalorder %s3748_s28, %s3748_s28 }
  0x55   : > { %p3243_p0 = scmp.ne.s32.totalorder %s3748_s28, %s3242_s25  ;;  %p3251_p9 = scmp.lt.s32.totalorder %s3242_s25, %s3242_s25 }
  0x57   : > { %p3245_p2 = pnand %p3243_p0, %p3760_p8  ;;  %p3252_p4 = por %p3251_p9, %p3250_p7 }
  0x59   : > { %p3246_p5 = pneg %p3245_p2 }
  0x5b   : > { %p3253_p10 = pnand %p3252_p4, %p3246_p5 }
  0x5d   : > { %3256 = shalt.err (!%p3253_p10)
}
  0x5e   : > { %3059 = dma.hbm_to_vmem [thread:$0]  (!%p3744_p6), %s4424_s6, 2048, %s3748_s28, [#allocation12], %s4368_s19, %s4368_s19, %s4370_s17  }
  0x5f   : > { %s4425_s10 = sld [smem:[#allocation46_spill]] }
  0x65   : > { %s3257_s20 = scalar_lea.hbm %s4425_s10, 2048 }
  0x66   : > { %p3258_p11 = scmp.ne.s32.totalorder %s4425_s10, %s3257_s20  ;;  %p3264_p0 = scmp.lt.u32.totalorder %s3257_s20, %s4425_s10 }
  0x68   : > { %p3260_p12 = pnand %p3258_p11, %p3760_p8 }
  0x6a   : > { %p3261_p13 = pneg %p3260_p12 }
  0x6c   : > { %p3266_p2 = pnand %p3264_p0, %p3261_p13 }
  0x6e   : > { %3269 = shalt.err (!%p3266_p2)
}
  0x6f   : > { %s3270_s28 = scalar_lea.vmem %s3750_s30, 2048  ;;  %p3278_p4 = scmp.lt.s32.totalorder %s3750_s30, %s3750_s30 }
  0x70   : > { %p3271_p5 = scmp.ne.s32.totalorder %s3750_s30, %s3270_s28  ;;  %p3279_p10 = scmp.lt.s32.totalorder %s3270_s28, %s3270_s28 }
  0x72   : > { %p3273_p7 = pnand %p3271_p5, %p3760_p8  ;;  %p3280_p11 = por %p3279_p10, %p3278_p4 }
  0x74   : > { %p3274_p9 = pneg %p3273_p7 }
  0x76   : > { %p3281_p12 = pnand %p3280_p11, %p3274_p9 }
  0x78   : > { %3284 = shalt.err (!%p3281_p12)
}
  0x79   : > { %3065 = dma.hbm_to_vmem [thread:$0]  (!%p3744_p6), %s4425_s10, 2048, %s3750_s30, [#allocation15], %s4368_s19, %s4368_s19, %s4370_s17  }
  0x7a   : > { %s2428_s12 = sadd.s32 4294967294, %s3579_s24   ;;  %s3838_s13 = sadd.s32 1, %s3579_s24  }
  0x7b   : > { %4426 = sst [smem:[#allocation31_spill]] %s3838_s13  ;;  %s52_s15 = sadd.s32 1, %s3575_s23 }
  0x7c   : > { %s49_s20 = ssub.s32 %s3579_s24, %s3838_s13  ;;  %p59_p13 = scmp.ne.s32.totalorder %s3575_s23, %s3571_s22 }
  0x7d   : > { %p50_p0 = scmp.eq.s32.totalorder %s49_s20, 0  ;;  %p60_p2 = scmp.eq.s32.totalorder %s3579_s24, 0 }
  0x7e   : > { %p65_p5 = scmp.ne.s32.totalorder %s3571_s22, %s3567_s1  ;;  %p503_p7 = scmp.eq.s32.totalorder %s3728_s3, 1 }
  0x7f   : > { %s3850_s0 = scalar_select %p50_p0, %s3575_s23, %s52_s15  }
  0x80   : > { %p61_p9 = por %p60_p2, %p59_p13  ;;  %p3854_p4 = por %p4376_p1, %p65_p5 }
  0x81   : > { %4427 = sst [smem:[#allocation32_spill]] %s3850_s0  ;;  %p3858_p10 = por %p503_p7, %p59_p13 }
  0x82   : > { %s4428_s30 = scalar_select %p3854_p4, 1, 0 }
  0x83   : > { %s4430_s21 = scalar_select %p3858_p10, 1, 0 }
  0x84   : > { %4429 = sst [smem:[#allocation33_spill]] %s4428_s30  ;;  %p509_p11 = scmp.eq.s32.totalorder %s2428_s12, 1 }
  0x85   : > { %4431 = sst [smem:[#allocation34_spill]] %s4430_s21  ;;  %p3095_p12 = scmp.lt.s32.totalorder %s3579_s24, 2 }
  0x86   : > { %s3864_s29 = sand.u32 1, %s3575_s23   ;;  %p3866_p3 = por %p509_p11, %p65_p5 }
  0x87   : > { %p3871_p0 = pnand %p3095_p12, %p61_p9  ;;  %s4374_s11 = sshll.u32 %s3864_s29, 4 }
  0x88   : > { %s4432_s18 = scalar_select %p3866_p3, 1, 0 }
  0x89   : > { %s4434_s25 = scalar_select %p3871_p0, 1, 0 }
  0x8a   : > { %4433 = sst [smem:[#allocation35_spill]] %s4432_s18  ;;  %s4375_s15 = sshll.u32 %s3579_s24, 8 }
  0x8b   : > { %s4435_s19 = sld [smem:[#allocation37_spill]]  ;;  %s659_s2 = scalar_lea.vmem [#allocation5], %s4374_s11 }
  0x8c   : > { %s666_s28 = sshll.u32 %s659_s2, 4  ;;  %s4436_s6 = sand.u32 1, %s3579_s24   ;;  %s3886_s28 = int_to_ptr.vmem [resolvable:$true] %s666_s28 }
  0x8d   : > { %s3890_s10 = scalar_lea.sflag [#allocation6], %s4436_s6  ;;  %p3896_p2 = pneg %p3871_p0 }
  0x8f   : > { %s4437_s23 = scalar_select %p3896_p2, 1, 0 }
  0x91   : > { %s3882_s17 = scalar_lea.hbm %s4435_s19, %s4375_s15  ;;  %s3290_s2 = scalar_lea.hbm %s4435_s19, 512 }
  0x92   : > { %s3285_s0 = scalar_lea.hbm %s3882_s17, 256  ;;  %p3291_p9 = scmp.lt.u32.totalorder %s3882_s17, %s4435_s19 }
  0x93   : > { %p3286_p13 = scmp.ne.s32.totalorder %s3882_s17, %s3285_s0  ;;  %p3292_p11 = scmp.lt.u32.totalorder %s3290_s2, %s3285_s0 }
  0x94   : > { %p3294_p1 = scmp.lt.u32.totalorder %s3285_s0, %s3882_s17 }
  0x95   : > { %p3288_p5 = pnand %p3896_p2, %p3286_p13  ;;  %p3293_p12 = por %p3292_p11, %p3291_p9 }
  0x97   : > { %p3289_p7 = pneg %p3288_p5  ;;  %p3295_p3 = por %p3294_p1, %p3293_p12 }
  0x99   : > { %p3296_p10 = pnand %p3295_p3, %p3289_p7 }
  0x9b   : > { %3299 = shalt.err (!%p3296_p10)
}
  0x9c   : > { %s3300_s6 = scalar_lea.vmem %s3886_s28, 256  ;;  %s3586_s20 = smov [#allocation5]  }
  0x9d   : > { %p3301_p13 = scmp.ne.s32.totalorder %s3886_s28, %s3300_s6  ;;  %s3305_s12 = sshll.u32 %s3586_s20, 4  ;;  %s3306_s12 = int_to_ptr.vmem [resolvable:$false] %s3305_s12 }
  0x9e   : > { %s3307_s11 = scalar_lea.vmem %s3306_s12, 512  ;;  %p3308_p6 = scmp.lt.s32.totalorder %s3886_s28, %s3306_s12 }
  0x9f   : > { %p3303_p5 = pnand %p3301_p13, %p3896_p2  ;;  %p3309_p8 = scmp.lt.s32.totalorder %s3307_s11, %s3300_s6 }
  0xa1   : > { %p3304_p4 = pneg %p3303_p5  ;;  %p3310_p9 = por %p3309_p8, %p3308_p6 }
  0xa3   : > { %p3311_p11 = pnand %p3310_p9, %p3304_p4 }
  0xa5   : > { %3314 = shalt.err (!%p3311_p11)
}
  0xa6   : > { %s4438_s0 = smov 8   ;;  %s4439_s15 = smov 128  }
  0xa7   : > { %3078 = dma.hbm_to_vmem [thread:$0]  (!%p3871_p0), %s3882_s17, 256, %s3886_s28, %s3890_s10, %s4439_s15, %s4439_s15, %s4438_s0  }
  0xa8   : > { %s4440_s2 = sshll.u32 %s3579_s24, 8  ;;  %s4441_s12 = sld [smem:[#allocation39_spill]] }
  0xa9   : > { %s4442_s11 = sshll.u32 %s3864_s29, 4  ;;  %s3587_s1 = smov [#allocation13]  }
  0xaa   : > { %s3932_s13 = scalar_lea.vmem [#allocation8], %s4442_s11  ;;  %s560_s21 = sshll.u32 %s3587_s1, 4  ;;  %s561_s21 = int_to_ptr.vmem [resolvable:$true] %s560_s21 }
  0xab   : > { %s4443_s8 = sld [smem:[#allocation44_spill]]  ;;  %p4444_p3 = scmp.ne.s32.totalorder %s4423_s27, 0 }
  0xae   : > { %s3928_s6 = scalar_lea.hbm %s4441_s12, %s4440_s2 }
  0xb1   : > { %s3315_s7 = scalar_lea.hbm %s4443_s8, 2048 }
  0xb2   : > { %p3316_p1 = scmp.ne.s32.totalorder %s4443_s8, %s3315_s7  ;;  %p3322_p4 = scmp.lt.u32.totalorder %s3315_s7, %s4443_s8 }
  0xb4   : > { %p3318_p6 = pnand %p3316_p1, %p4444_p3 }
  0xb6   : > { %p3319_p8 = pneg %p3318_p6 }
  0xb8   : > { %p3324_p10 = pnand %p3322_p4, %p3319_p8 }
  0xba   : > { %3327 = shalt.err (!%p3324_p10)
}
  0xbb   : > { %s3328_s2 = scalar_lea.vmem %s561_s21, 2048  ;;  %p3336_p5 = scmp.lt.s32.totalorder %s561_s21, %s561_s21 }
  0xbc   : > { %p3329_p7 = scmp.ne.s32.totalorder %s561_s21, %s3328_s2  ;;  %p3337_p9 = scmp.lt.s32.totalorder %s3328_s2, %s3328_s2 }
  0xbe   : > { %p3331_p12 = pnand %p3329_p7, %p4444_p3  ;;  %p3338_p11 = por %p3337_p9, %p3336_p5 }
  0xc0   : > { %p3332_p13 = pneg %p3331_p12 }
  0xc2   : > { %p3339_p0 = pnand %p3338_p11, %p3332_p13 }
  0xc4   : > { %3342 = shalt.err (!%p3339_p0)
}
  0xc5   : > { %p4445_p1 = scmp.ne.s32.totalorder %s4421_s4, 0  ;;  %s3588_s9 = smov [#allocation16]  }
  0xc6   : > { %s598_s1 = sshll.u32 %s3588_s9, 4  ;;  %s3343_s11 = scalar_lea.hbm %s4354_s14, 4096  ;;  %s599_s1 = int_to_ptr.vmem [resolvable:$true] %s598_s1 }
  0xc7   : > { %3062 = dma.hbm_to_vmem [thread:$0]  (!%p4445_p1), %s4443_s8, 2048, %s561_s21, [#allocation12], %s4439_s15, %s4439_s15, %s4438_s0  }
  0xc8   : > { %p3344_p0 = scmp.ne.s32.totalorder %s4354_s14, %s3343_s11  ;;  %p3350_p4 = scmp.lt.u32.totalorder %s3343_s11, %s4354_s14 }
  0xca   : > { %p3346_p6 = pnand %p3344_p0, %p4444_p3 }
  0xcc   : > { %p3347_p8 = pneg %p3346_p6 }
  0xce   : > { %p3352_p10 = pnand %p3350_p4, %p3347_p8 }
  0xd0   : > { %3355 = shalt.err (!%p3352_p10)
}
  0xd1   : > { %s3356_s21 = scalar_lea.vmem %s599_s1, 4096  ;;  %p3364_p5 = scmp.lt.s32.totalorder %s599_s1, %s599_s1 }
  0xd2   : > { %p3357_p7 = scmp.ne.s32.totalorder %s599_s1, %s3356_s21  ;;  %p3365_p9 = scmp.lt.s32.totalorder %s3356_s21, %s3356_s21 }
  0xd4   : > { %p3359_p12 = pnand %p3357_p7, %p4444_p3  ;;  %p3366_p11 = por %p3365_p9, %p3364_p5 }
  0xd6   : > { %p3360_p13 = pneg %p3359_p12 }
  0xd8   : > { %p3367_p2 = pnand %p3366_p11, %p3360_p13 }
  0xda   : > { %3370 = shalt.err (!%p3367_p2)
}
  0xdb   : > { %s3589_s5 = smov 256   ;;  %s3590_s7 = smov 16  }
  0xdc   : > { %3068 = dma.hbm_to_vmem [thread:$0]  (!%p4445_p1), %s4354_s14, 4096, %s599_s1, [#allocation15], %s3589_s5, %s3589_s5, %s3590_s7  }
  0xdd   : > { %s3591_s20 = smov [#allocation17]   ;;  %s2437_s17 = sshll.u32 %s3864_s29, 3 }
  0xde   : > { %s614_s11 = sshll.u32 %s3591_s20, 4  ;;  %s3371_s2 = scalar_lea.hbm %s4356_s16, 4096  ;;  %s615_s11 = int_to_ptr.vmem [resolvable:$true] %s614_s11 }
  0xdf   : > { %p3372_p2 = scmp.ne.s32.totalorder %s4356_s16, %s3371_s2  ;;  %p3378_p8 = scmp.lt.u32.totalorder %s3371_s2, %s4356_s16 }
  0xe1   : > { %p3374_p0 = pnand %p3372_p2, %p4444_p3 }
  0xe3   : > { %p3375_p6 = pneg %p3374_p0 }
  0xe5   : > { %p3380_p4 = pnand %p3378_p8, %p3375_p6 }
  0xe7   : > { %3383 = shalt.err (!%p3380_p4)
}
  0xe8   : > { %s3384_s1 = scalar_lea.vmem %s615_s11, 4096  ;;  %p3392_p13 = scmp.lt.s32.totalorder %s615_s11, %s615_s11 }
  0xe9   : > { %p3385_p10 = scmp.ne.s32.totalorder %s615_s11, %s3384_s1  ;;  %p3393_p5 = scmp.lt.s32.totalorder %s3384_s1, %s3384_s1 }
  0xeb   : > { %p3387_p7 = pnand %p3385_p10, %p4444_p3  ;;  %p3394_p9 = por %p3393_p5, %p3392_p13 }
  0xed   : > { %p3388_p12 = pneg %p3387_p7 }
  0xef   : > { %p3395_p11 = pnand %p3394_p9, %p3388_p12 }
  0xf1   : > { %3398 = shalt.err (!%p3395_p11)
}
  0xf2   : > { %3071 = dma.hbm_to_vmem [thread:$0]  (!%p4445_p1), %s4356_s16, 4096, %s615_s11, [#allocation18], %s4439_s15, %s4439_s15, %s4438_s0  }
  0xf3   : > { %s2438_s27 = sshll.u32 %s3579_s24, 7  ;;  %s641_s18 = scalar_lea.vmem [#allocation2], %s2437_s17 }
  0xf4   : > { %s648_s5 = sshll.u32 %s641_s18, 4  ;;  %s4446_s4 = sld [smem:[#allocation36_spill]]  ;;  %s649_s5 = int_to_ptr.vmem [resolvable:$true] %s648_s5 }
  0xf5   : > { %s638_s20 = scalar_lea.sflag [#allocation3], %s3864_s29  ;;  %p4447_p2 = scmp.ne.s32.totalorder %s4437_s23, 0 }
  0xfa   : > { %s4004_s3 = scalar_lea.hbm %s4446_s4, %s2438_s27  ;;  %s3404_s2 = scalar_lea.hbm %s4446_s4, 256 }
  0xfb   : > { %s3399_s19 = scalar_lea.hbm %s4004_s3, 128  ;;  %p3405_p6 = scmp.lt.u32.totalorder %s4004_s3, %s4446_s4 }
  0xfc   : > { %p3400_p3 = scmp.ne.s32.totalorder %s4004_s3, %s3399_s19  ;;  %p3406_p8 = scmp.lt.u32.totalorder %s3404_s2, %s3399_s19 }
  0xfd   : > { %p3408_p10 = scmp.lt.u32.totalorder %s3399_s19, %s4004_s3 }
  0xfe   : > { %p3402_p1 = pnand %p3400_p3, %p4447_p2  ;;  %p3407_p4 = por %p3406_p8, %p3405_p6 }
 0x100   : > { %p3403_p0 = pneg %p3402_p1  ;;  %p3409_p7 = por %p3408_p10, %p3407_p4 }
 0x102   : > { %p3410_p12 = pnand %p3409_p7, %p3403_p0 }
 0x104   : > { %3413 = shalt.err (!%p3410_p12)
}
 0x105   : > { %s3414_s8 = scalar_lea.vmem %s649_s5, 128  ;;  %s3592_s30 = smov [#allocation2]  }
 0x106   : > { %p3415_p13 = scmp.ne.s32.totalorder %s649_s5, %s3414_s8  ;;  %s3419_s18 = sshll.u32 %s3592_s30, 4  ;;  %s3420_s18 = int_to_ptr.vmem [resolvable:$false] %s3419_s18 }
 0x107   : > { %s3421_s7 = scalar_lea.vmem %s3420_s18, 256  ;;  %p3422_p11 = scmp.lt.s32.totalorder %s649_s5, %s3420_s18 }
 0x108   : > { %p3417_p5 = pnand %p3415_p13, %p4447_p2  ;;  %p3423_p3 = scmp.lt.s32.totalorder %s3421_s7, %s3414_s8 }
 0x10a   : > { %p3418_p9 = pneg %p3417_p5  ;;  %p3424_p1 = por %p3423_p3, %p3422_p11 }
 0x10c   : > { %p3425_p6 = pnand %p3424_p1, %p3418_p9 }
 0x10e   : > { %3428 = shalt.err (!%p3425_p6)
}
 0x10f   : > { %p4448_p8 = scmp.ne.s32.totalorder %s4434_s25, 0  ;;  %s4449_s11 = sld [smem:[#allocation38_spill]] }
 0x110   : > { %s4450_s2 = sshll.u32 %s3932_s13, 4  ;;  %s680_s21 = scalar_lea.vmem [#allocation7], %s2437_s17  ;;  %s4033_s2 = int_to_ptr.vmem [resolvable:$true] %s4450_s2 }
 0x111   : > { %3075 = dma.hbm_to_vmem [thread:$0]  (!%p4448_p8), %s4004_s3, 128, %s649_s5, %s638_s20  }
 0x112   : > { %s687_s1 = sshll.u32 %s680_s21, 4  ;;  %s688_s1 = int_to_ptr.vmem [resolvable:$true] %s687_s1 }
 0x115   : > { %s4029_s28 = scalar_lea.hbm %s4449_s11, %s2438_s27  ;;  %s3434_s27 = scalar_lea.hbm %s4449_s11, 256 }
 0x116   : > { %s3429_s8 = scalar_lea.hbm %s4029_s28, 128  ;;  %p3435_p7 = scmp.lt.u32.totalorder %s4029_s28, %s4449_s11 }
 0x117   : > { %p3430_p0 = scmp.ne.s32.totalorder %s4029_s28, %s3429_s8  ;;  %p3436_p12 = scmp.lt.u32.totalorder %s3434_s27, %s3429_s8 }
 0x118   : > { %p3438_p5 = scmp.lt.u32.totalorder %s3429_s8, %s4029_s28 }
 0x119   : > { %p3432_p4 = pnand %p3430_p0, %p4447_p2  ;;  %p3437_p13 = por %p3436_p12, %p3435_p7 }
 0x11b   : > { %p3433_p10 = pneg %p3432_p4  ;;  %p3439_p9 = por %p3438_p5, %p3437_p13 }
 0x11d   : > { %p3440_p11 = pnand %p3439_p9, %p3433_p10 }
 0x11f   : > { %3443 = shalt.err (!%p3440_p11)
}
 0x120   : > { %s3444_s29 = scalar_lea.vmem %s688_s1, 128  ;;  %s3593_s17 = smov [#allocation7]  }
 0x121   : > { %p3445_p3 = scmp.ne.s32.totalorder %s688_s1, %s3444_s29  ;;  %s3449_s30 = sshll.u32 %s3593_s17, 4  ;;  %s3450_s30 = int_to_ptr.vmem [resolvable:$false] %s3449_s30 }
 0x122   : > { %s3451_s18 = scalar_lea.vmem %s3450_s30, 256  ;;  %p3452_p0 = scmp.lt.s32.totalorder %s688_s1, %s3450_s30 }
 0x123   : > { %p3447_p1 = pnand %p3445_p3, %p4447_p2  ;;  %p3453_p4 = scmp.lt.s32.totalorder %s3451_s18, %s3444_s29 }
 0x125   : > { %p3448_p6 = pneg %p3447_p1  ;;  %p3454_p8 = por %p3453_p4, %p3452_p0 }
 0x127   : > { %p3455_p7 = pnand %p3454_p8, %p3448_p6 }
 0x129   : > { %3458 = shalt.err (!%p3455_p7)
}
 0x12a   : > { %p4451_p12 = scmp.ne.s32.totalorder %s4434_s25, 0  ;;  %s4452_s7 = sand.u32 1, %s3579_s24  }
 0x12b   : > { %s4057_s9 = scalar_lea.sflag [#allocation9], %s4452_s7  ;;  %s3459_s19 = scalar_lea.hbm %s3928_s6, 256 }
 0x12c   : > { %3081 = dma.hbm_to_vmem [thread:$0]  (!%p4451_p12), %s4029_s28, 128, %s688_s1, %s3890_s10  }
 0x12d   : > { %p3460_p10 = scmp.ne.s32.totalorder %s3928_s6, %s3459_s19  ;;  %s3464_s5 = scalar_lea.hbm %s4441_s12, 512 }
 0x12e   : > { %p3465_p5 = scmp.lt.u32.totalorder %s3928_s6, %s4441_s12  ;;  %p3466_p9 = scmp.lt.u32.totalorder %s3464_s5, %s3459_s19 }
 0x12f   : > { %p3462_p13 = pnand %p3460_p10, %p4447_p2  ;;  %p3468_p3 = scmp.lt.u32.totalorder %s3459_s19, %s3928_s6 }
 0x130   : > { %p3467_p11 = por %p3466_p9, %p3465_p5 }
 0x131   : > { %p3463_p8 = pneg %p3462_p13 }
 0x132   : > { %p3469_p1 = por %p3468_p3, %p3467_p11 }
 0x134   : > { %p3470_p6 = pnand %p3469_p1, %p3463_p8 }
 0x136   : > { %3473 = shalt.err (!%p3470_p6)
}
 0x137   : > { %s3474_s10 = scalar_lea.vmem %s4033_s2, 256  ;;  %s3594_s28 = smov [#allocation8]  }
 0x138   : > { %p3475_p0 = scmp.ne.s32.totalorder %s4033_s2, %s3474_s10  ;;  %s3479_s1 = sshll.u32 %s3594_s28, 4  ;;  %s3480_s1 = int_to_ptr.vmem [resolvable:$false] %s3479_s1 }
 0x139   : > { %s3481_s13 = scalar_lea.vmem %s3480_s1, 512  ;;  %p3482_p10 = scmp.lt.s32.totalorder %s4033_s2, %s3480_s1 }
 0x13a   : > { %p3477_p4 = pnand %p3475_p0, %p4447_p2  ;;  %p3483_p13 = scmp.lt.s32.totalorder %s3481_s13, %s3474_s10 }
 0x13c   : > { %p3478_p7 = pneg %p3477_p4  ;;  %p3484_p5 = por %p3483_p13, %p3482_p10 }
 0x13e   : > { %p3485_p9 = pnand %p3484_p5, %p3478_p7 }
 0x140   : > { %3488 = shalt.err (!%p3485_p9)
}
 0x141   : > { %3084 = dma.hbm_to_vmem [thread:$0]  (!%p4451_p12), %s3928_s6, 256, %s4033_s2, %s4057_s9, %s4439_s15, %s4439_s15, %s4438_s0  }
 0x142   : > { %p4453_p2 = scmp.ne.s32.totalorder %s4420_s26, 0 }
 0x143   : > { %s4454_s23 = sld [smem:[#allocation33_spill]] (!%p4453_p2)  ;;  %s4087_s20 = sand.u32 (!%p4453_p2), 1, %s3571_s22  }
 0x144   : > { %717 = sbr.rel (%p4453_p2) target bundleno = 4363 (0x110b), region = 100  ;;  %s4090_s29 = sshll.u32 (!%p4453_p2), %s4087_s20, 3 }
 0x145   : > { %s720_s25 = scalar_lea.sflag (!%p4453_p2), [#allocation3], %s4087_s20  ;;  %s723_s17 = scalar_lea.vmem (!%p4453_p2), [#allocation2], %s4090_s29 }
 0x149   : > { %p4455_p8 = scmp.ne.s32.totalorder (!%p4453_p2), %s4454_s23, 0 }
 0x14b   : > { %3534 = dma.done.wait (%p4455_p8), %s720_s25, 128  }
 0x14c   : > { %3536 = vsyncadd (%p4455_p8), %s720_s25, 4294967168  ;;  %s4456_s0 = sld [smem:[#allocation30_spill]]  ;;  %s2449_s15 = sshll.u32 %s4087_s20, 4 }
 0x14d   : > { %s4100_s2 = scalar_lea.vmem [#allocation5], %s2449_s15 }
 0x152   : > { %s728_s26 = sand.u32 1, %s4456_s0  }
 0x153   : > { %s729_s6 = scalar_lea.sflag [#allocation6], %s728_s26 }
 0x154   : > { %3538 = dma.done.wait (%p4455_p8), %s729_s6, 384  }
 0x155   : > { %3540 = vsyncadd (%p4455_p8), %s729_s6, 4294966912  ;;  %s741_s30 = scalar_lea.vmem [#allocation7], %s4090_s29  ;;  %s747_s18 = scalar_lea.sflag [#allocation9], %s728_s26 }
 0x156   : > { %s4107_s7 = scalar_lea.vmem [#allocation8], %s2449_s15 }
 0x157   : > { %3542 = dma.done.wait (%p4455_p8), %s747_s18, 256  }
 0x158   : > { %3544 = vsyncadd (%p4455_p8), %s747_s18, 4294967040  ;;  %p4457_p12 = scmp.eq.s32.totalorder %s4456_s0, 0 }
 0x15a   : > { %3546 = dma.done.wait (%p4457_p12), [#allocation9], 2048   ;;  %p4458_p11 = pmov %p4457_p12 }
 0x15c   : > { %3548 = vsyncadd (%p4458_p11), [#allocation9], 4294965248  ;;  %p4459_p3 = pmov %p4458_p11 }
 0x15e   : > { %3550 = dma.done.wait (%p4459_p3), [#allocation12], 4096   ;;  %p4460_p1 = pmov %p4459_p3 }
 0x160   : > { %3552 = vsyncadd (%p4460_p1), [#allocation12], 4294963200  ;;  %p4461_p6 = pmov %p4460_p1 }
 0x161   : > { %p4462_p0 = pmov %p4460_p1 }
 0x162   : > { %3554 = dma.done.wait (%p4461_p6), [#allocation15], 6144  }
 0x163   : > { %3556 = vsyncadd (%p4462_p0), [#allocation15], 4294961152  ;;  %p4463_p4 = pmov %p4462_p0 }
 0x164   : > { %p4464_p7 = pmov %p4462_p0 }
 0x165   : > { %3558 = dma.done.wait (%p4463_p4), [#allocation18], 4096  }
 0x166   : > { %3560 = vsyncadd (%p4464_p7), [#allocation18], 4294963200  ;;  %v3595_v0 = vmov 0.0|0.0   ;;  %vm3596_vm0 = vmmov 0   ;;  %v3597_v1 = vmov 0.0   ;;  %v948_v2 = vld [vmem:[#allocation11] sm:$0xff] }
 0x167   : > { %2815 = vmatprep.subr.bf16.mxu0 %v3595_v0  ;;  %2651 = vmatprep.mubr.msk.f32.mxu0 %vm3596_vm0, %v3597_v1  ;;  %v949_v3 = vld [vmem:[#allocation11 + $0x8] sm:$0xff]  ;;  %v950_v4 = vld [vmem:[#allocation11 + $0x10] sm:$0xff]  ;;  %v951_v6 = vld [vmem:[#allocation11 + $0x18] sm:$0xff]  ;;  %s4465_s21 = sld [smem:[#allocation43_spill]]  ;;  %vm1144_vm1 = vcmask 261120   ;;  %s4468_s3 = sld [smem:[#allocation41_spill]] }
 0x168   : > { %v2839_v5 = vpack.c.bf16 %v949_v3, %v948_v2  ;;  %v952_v7 = vld [vmem:[#allocation11 + $0x20] sm:$0xff]  ;;  %v2843_v8 = vpack.c.bf16 %v951_v6, %v950_v4  ;;  %v953_v9 = vld [vmem:[#allocation11 + $0x28] sm:$0xff]  ;;  %v857_v13 = vld [vmem:[#allocation10 + $0x10] sm:$0xff]  ;;  %s3598_s27 = smov 96   ;;  %vm1224_vm3 = vcmask 130048   ;;  %s4469_s1 = sld [smem:[#allocation45_spill]] }
 0x169   : > { %v855_v10 = vld [vmem:[#allocation10] sm:$0xff]  ;;  %v856_v11 = vld [vmem:[#allocation10 + $0x8] sm:$0xff]  ;;  %v858_v14 = vld [vmem:[#allocation10 + $0x18] sm:$0xff]  ;;  %v2847_v15 = vpack.c.bf16 %v953_v9, %v952_v7  ;;  %s3599_s13 = smov 64   ;;  %s3600_s23 = smov 32   ;;  %vm1840_vm4 = vcmask 523264  }
 0x16a   : > { %2840 = vmatprep.subr.bf16.mxu1 %v2839_v5  ;;  %v2816_v12 = vpack.c.bf16 %v856_v11, %v855_v10  ;;  %v954_v16 = vld [vmem:[#allocation11 + $0x30] sm:$0xff]  ;;  %v2819_v17 = vpack.c.bf16 %v858_v14, %v857_v13  ;;  %v955_v18 = vld [vmem:[#allocation11 + $0x38] sm:$0xff]  ;;  %v859_v19 = vld [vmem:[#allocation10 + $0x20] sm:$0xff]  ;;  %vm1842_vm5 = vcmask 785408   ;;  %s4470_s26 = sld [smem:[#allocation47_spill]]  ;;  %s4477_s25 = sld [smem:[#allocation53_spill]] }
 0x16b   : > { %2842 = vmatpush3.bf16.msra.mxu1 %v2839_v5  ;;  %v860_v20 = vld [vmem:[#allocation10 + $0x28] sm:$0xff]  ;;  %v2851_v21 = vpack.c.bf16 %v955_v18, %v954_v16  ;;  %v956_v22 = vld [vmem:[#allocation11 + $0x40] sm:$0xff]  ;;  %v861_v27 = vld [vmem:[#allocation10 + $0x30] sm:$0xff] }
 0x16c   : > { %2844 = vmatprep.subr.bf16.mxu1 %v2843_v8  ;;  %2817 = vmatpush3.bf16.msra.mxu0 %v2816_v12  ;;  %v2822_v23 = vpack.c.bf16 %v860_v20, %v859_v19  ;;  %v4134_v24 = vld [vmem:[%s4100_s2] sm:$0xff]  ;;  %v851_v25 = vld [vmem:[%s4107_s7] sm:$0xff]  ;;  %v957_v26 = vld [vmem:[#allocation11 + $0x48] sm:$0xff] }
 0x16d   : > { %2818 = vmatprep.subr.bf16.mxu0 %v3595_v0  ;;  %v862_v28 = vld [vmem:[#allocation10 + $0x38] sm:$0xff]  ;;  %v853_v29 = vadd.f32 %v851_v25, %v4134_v24  ;;  %v2855_v30 = vpack.c.bf16 %v957_v26, %v956_v22  ;;  %v958_v31 = vld [vmem:[#allocation11 + $0x50] sm:$0xff]  ;;  %v863_v34 = vld [vmem:[#allocation10 + $0x40] sm:$0xff] }
 0x16e   : > { %v2825_v32 = vpack.c.bf16 %v862_v28, %v861_v27  ;;  %v959_v33 = vld [vmem:[#allocation11 + $0x58] sm:$0xff]  ;;  %v864_v35 = vld [vmem:[#allocation10 + $0x48] sm:$0xff]  ;;  %v960_v37 = vld [vmem:[#allocation11 + $0x60] sm:$0xff] }
 0x16f   : > { %2846 = vmatpush3.bf16.msra.mxu1 %v2843_v8  ;;  %2686 = vmatprep.mubr.f32.mxu1 %v853_v29  ;;  %v2859_v36 = vpack.c.bf16 %v959_v33, %v958_v31  ;;  %v2828_v38 = vpack.c.bf16 %v864_v35, %v863_v34  ;;  %v961_v39 = vld [vmem:[#allocation11 + $0x68] sm:$0xff]  ;;  %v865_v40 = vld [vmem:[#allocation10 + $0x50] sm:$0xff]  ;;  %v866_v41 = vld [vmem:[#allocation10 + $0x58] sm:$0xff] }
 0x170   : > { %2848 = vmatprep.subr.bf16.mxu1 %v2847_v15  ;;  %2820 = vmatpush3.bf16.msra.mxu0 %v2819_v17  ;;  %v2863_v42 = vpack.c.bf16 %v961_v39, %v960_v37  ;;  %v962_v43 = vld [vmem:[#allocation11 + $0x70] sm:$0xff]  ;;  %v2831_v44 = vpack.c.bf16 %v866_v41, %v865_v40  ;;  %v963_v45 = vld [vmem:[#allocation11 + $0x78] sm:$0xff]  ;;  %v867_v46 = vld [vmem:[#allocation10 + $0x60] sm:$0xff] }
 0x171   : > { %2821 = vmatprep.subr.bf16.mxu0 %v3595_v0  ;;  %v868_v47 = vld [vmem:[#allocation10 + $0x68] sm:$0xff]  ;;  %v2867_v48 = vpack.c.bf16 %v963_v45, %v962_v43  ;;  %v869_v50 = vld [vmem:[#allocation10 + $0x70] sm:$0xff]  ;;  %v870_v51 = vld [vmem:[#allocation10 + $0x78] sm:$0xff] }
 0x172   : > { %v2834_v49 = vpack.c.bf16 %v868_v47, %v867_v46  ;;  %v4144_v52 = vld [vmem:[%s4100_s2 + $0x8] sm:$0xff]  ;;  %v852_v53 = vld [vmem:[%s4107_s7 + $0x8] sm:$0xff]  ;;  %v2837_v54 = vpack.c.bf16 %v870_v51, %v869_v50  ;;  %v2460_v59 = vld [vmem:[%s4465_s21] ss:$0 sm:$0xff]  ;;  %s4471_s2 = sld [smem:[#allocation48_spill]]  ;;  %s4472_s7 = sld [smem:[#allocation49_spill]] }
 0x173   : > { %2850 = vmatpush3.bf16.msra.mxu1 %v2847_v15  ;;  %v4149_v55 = vld [vmem:[%s723_s17] sm:$0xff]  ;;  %v847_v56 = vld [vmem:[%s741_s30] sm:$0xff]  ;;  %v854_v57 = vadd.f32 %v852_v53, %v4144_v52  ;;  %vm4165_vm2 = vmpackc.low %vm1144_vm1, %vm1144_vm1  ;;  %s4473_s21 = sld [smem:[#allocation50_spill]]  ;;  %s2485_s17 = sshll.u32 %s4456_s0, 7 }
 0x174   : > { %2852 = vmatprep.subr.bf16.mxu1 %v2851_v21  ;;  %2823 = vmatpush3.bf16.msra.mxu0 %v2822_v23  ;;  %v848_v58 = vadd.f32 %v847_v56, %v4149_v55  ;;  %v2459_v5 = vld [vmem:[%s4468_s3] ss:$0 sm:$0xff]  ;;  %v1047_v10 = vld [vmem:[#allocation13 + $0x8] sm:$0xff]  ;;  %v1048_v11 = vld [vmem:[#allocation13 + $0x10] sm:$0xff]  ;;  %s4474_s3 = sld [smem:[#allocation51_spill]]  ;;  %s4478_s30 = sld [smem:[#allocation54_spill]] }
 0x175   : > { %2824 = vmatprep.subr.bf16.mxu0 %v3595_v0  ;;  %v1046_v9 = vld [vmem:[#allocation13] sm:$0xff]  ;;  %v1049_v13 = vld [vmem:[#allocation13 + $0x18] sm:$0xff]  ;;  %v1051_v16 = vld [vmem:[#allocation13 + $0x28] sm:$0xff] }
 0x176   : > { %v2871_v12 = vpack.c.bf16 %v1047_v10, %v1046_v9  ;;  %v2875_v14 = vpack.c.bf16 %v1049_v13, %v1048_v11  ;;  %v1050_v15 = vld [vmem:[#allocation13 + $0x20] sm:$0xff]  ;;  %v1052_v18 = vld [vmem:[#allocation13 + $0x30] sm:$0xff]  ;;  %v1053_v19 = vld [vmem:[#allocation13 + $0x38] sm:$0xff] }
 0x177   : > { %2854 = vmatpush3.bf16.msra.mxu1 %v2851_v21  ;;  %v2879_v17 = vpack.c.bf16 %v1051_v16, %v1050_v15  ;;  %v2883_v20 = vpack.c.bf16 %v1053_v19, %v1052_v18  ;;  %v1054_v21 = vld [vmem:[#allocation13 + $0x40] sm:$0xff]  ;;  %v1055_v22 = vld [vmem:[#allocation13 + $0x48] sm:$0xff]  ;;  %v1057_v25 = vld [vmem:[#allocation13 + $0x58] sm:$0xff] }
 0x178   : > { %2856 = vmatprep.subr.bf16.mxu1 %v2855_v30  ;;  %2826 = vmatpush3.bf16.msra.mxu0 %v2825_v32  ;;  %v2887_v23 = vpack.c.bf16 %v1055_v22, %v1054_v21  ;;  %v1058_v27 = vld [vmem:[#allocation13 + $0x60] sm:$0xff]  ;;  %v1059_v28 = vld [vmem:[#allocation13 + $0x68] sm:$0xff]  ;;  %v1061_v31 = vld [vmem:[#allocation13 + $0x78] sm:$0xff] }
 0x179   : > { %2827 = vmatprep.subr.bf16.mxu0 %v3595_v0  ;;  %v2895_v29 = vpack.c.bf16 %v1059_v28, %v1058_v27  ;;  %v2461_v43 = vld [vmem:[%s4469_s1] ss:$0 sm:$0xff]  ;;  %s4476_s1 = sld [smem:[#allocation52_spill]] }
 0x17a   : > { %s4296_s18 = scalar_lea.hbm %s4478_s30, %s2485_s17 }
 0x17b   : > { %2858 = vmatpush3.bf16.msra.mxu1 %v2855_v30  ;;  %v1060_v30 = vld [vmem:[#allocation13 + $0x70] sm:$0xff] }
 0x17c   : > { %2860 = vmatprep.subr.bf16.mxu1 %v2859_v36  ;;  %2829 = vmatpush3.bf16.msra.mxu0 %v2828_v38  ;;  %v2899_v32 = vpack.c.bf16 %v1061_v31, %v1060_v30 }
 0x17d   : > { %2830 = vmatprep.subr.bf16.mxu0 %v3595_v0 }
 0x17f   : > { %2862 = vmatpush3.bf16.msra.mxu1 %v2859_v36 }
 0x180   : > { %2864 = vmatprep.subr.bf16.mxu1 %v2863_v42  ;;  %2832 = vmatpush3.bf16.msra.mxu0 %v2831_v44 }
 0x181   : > { %2833 = vmatprep.subr.bf16.mxu0 %v3595_v0 }
 0x183   : > { %2866 = vmatpush3.bf16.msra.mxu1 %v2863_v42 }
 0x184   : > { %2868 = vmatprep.subr.bf16.mxu1 %v2867_v48  ;;  %2835 = vmatpush3.bf16.msra.mxu0 %v2834_v49 }
 0x185   : > { %2836 = vmatprep.subr.bf16.mxu0 %v3595_v0 }
 0x187   : > { %2870 = vmatpush3.bf16.msra.mxu1 %v2867_v48 }
 0x188   : > { %2838 = vmatpush3.bf16.msra.mxu0 %v2837_v54  ;;  %2903 = vmatprep.subr.bf16.mxu1 %v3595_v0 }
 0x189   : > { %2872 = vmatprep.subr.bf16.mxu0 %v2871_v12 }
 0x18a   : > { %2687 = vmatmul.mubr.f32.vlgmr.msra.gmra.mrb[0].mxu1 %v854_v57 }
 0x18b   : > { %2652 = vmatmul.mubr.f32.vlgmr.msra.gmra.mrb[0].mxu0 %v848_v58  ;;  %2728 = vmatprep.mubr.msk.f32.mxu1 %vm3596_vm0, %v3597_v1 }
 0x18c   : > { %2721 = vmatprep.mubr.f32.mxu0 %v4134_v24  ;;  %2874 = vmatpush3.bf16.msra.mxu0 %v2871_v12  ;;  %v1056_v24 = vld [vmem:[#allocation13 + $0x50] sm:$0xff] }
 0x18d   : > { %2876 = vmatprep.subr.bf16.mxu0 %v2875_v14  ;;  %v2891_v26 = vpack.c.bf16 %v1057_v25, %v1056_v24 }
 0x190   : > { %2878 = vmatpush3.bf16.msra.mxu0 %v2875_v14 }
 0x191   : > { %2880 = vmatprep.subr.bf16.mxu0 %v2879_v17 }
 0x194   : > { %2882 = vmatpush3.bf16.msra.mxu0 %v2879_v17 }
 0x195   : > { %2884 = vmatprep.subr.bf16.mxu0 %v2883_v20 }
 0x198   : > { %2886 = vmatpush3.bf16.msra.mxu0 %v2883_v20 }
 0x199   : > { %2888 = vmatprep.subr.bf16.mxu0 %v2887_v23 }
 0x19c   : > { %2890 = vmatpush3.bf16.msra.mxu0 %v2887_v23 }
 0x19d   : > { %2892 = vmatprep.subr.bf16.mxu0 %v2891_v26 }
 0x1a0   : > { %2894 = vmatpush3.bf16.msra.mxu0 %v2891_v26 }
 0x1a1   : > { %2896 = vmatprep.subr.bf16.mxu0 %v2895_v29 }
 0x1a4   : > { %2898 = vmatpush3.bf16.msra.mxu0 %v2895_v29 }
 0x1a5   : > { %2900 = vmatprep.subr.bf16.mxu0 %v2899_v32 }
 0x1a8   : > { %2902 = vmatpush3.bf16.msra.mxu0 %v2899_v32 }
 0x1a9   : > { %2931 = vmatprep.subr.bf16.mxu0 %v3595_v0 }
 0x1ab   : > { %2722 = vmatmul.mubr.f32.vlgmr.msra.gmra.mrb[2].mxu0 %v4144_v52 }
 0x1ac   : > { %2812 = vmatprep.mubr.msk.f32.mxu0 %vm3596_vm0, %v3597_v1 }
 0x25d   : > { %v2688_v60 = vpop.f32.mrb[0].mxu1 }
 0x25e   : > { %v1043_v61 = vadd.f32 %v2688_v60, %v2460_v59  ;;  %v1037_v62 = vpop.f32.mrb[1].mxu1  ;;  %v944_v63 = vpop.f32.mrb[0].mxu0 }
 0x25f   : > { %v1038_v2 = vadd.f32 %v2460_v59, %v1037_v62  ;;  %v2653_v3 = vpop.f32.mrb[1].mxu0  ;;  %v4178_v8 = vadd.f32 %v2459_v5, %v944_v63 }
 0x261   : > { %v2904_v6 = vpack.c.bf16 %v1043_v61, %v1038_v2  ;;  %v4172_v7 = vpack.i.bf16 %v1043_v61, %v1038_v2 }
 0x263   : > { %3152 = vrot.lane.b32.xlu1 %v4172_v7, %s3598_s27  ;;  %2906 = vmatpush3.bf16.xpose.msk.msra.mxu1 %vm4165_vm2, %v2904_v6 }
 0x264   : > { %2907 = vmatprep.subr.bf16.mxu1 %v3595_v0 }
 0x267   : > { %1309 = vrot.lane.b32.xlu1 %v4178_v8, %s3598_s27 }
 0x26a   : > { %2729 = vmatmul.mubr.msk.f32.vlgmr.msra.gmra.mrb[2].mxu1 %vm1144_vm1, %v4178_v8 }
 0x26b   : > { %2735 = vmatprep.mubr.msk.f32.mxu1 %vm3596_vm0, %v3597_v1 }
 0x27e   : > { %v2723_v36 = vpop.f32.mrb[2].mxu0 }
 0x27f   : > { %v1135_v37 = vpop.f32.mrb[3].mxu0  ;;  %v1141_v44 = vadd.f32 %v2723_v36, %v2461_v43 }
 0x280   : > { %v1136_v45 = vadd.f32 %v2461_v43, %v1135_v37 }
 0x282   : > { %v2908_v46 = vpack.c.bf16 %v1141_v44, %v1136_v45  ;;  %v4196_v47 = vpack.i.bf16 %v1141_v44, %v1136_v45 }
 0x284   : > { %2909 = vmatpush3.bf16.msra.mxu1 %v2908_v46 }
 0x285   : > { %2910 = vmatprep.subr.bf16.mxu1 %v3595_v0 }
 0x2d5   : > { %v3153_v49 = vpop.permute.xlu1 %3152 }
 0x2d6   : > { %v3155_v50 = vunpack.i.h.bf16 %v3153_v49  ;;  %v3154_v51 = vunpack.i.l.bf16 %v3153_v49 }
 0x2d8   : > { %v2911_v54 = vpack.c.bf16 %v3155_v50, %v3154_v51 }
 0x2d9   : > { %v1310_v56 = vpop.permute.xlu1 %1309 }
 0x33d   : > { %v1220_v33 = vpop.f32.mrb[2].mxu1 }
 0x33e   : > { %v2730_v34 = vpop.f32.mrb[3].mxu1  ;;  %v1225_v35 = vsel %vm1224_vm3, %v1220_v33, -inf }
 0x33f   : > { %1226 = vmax.xlane.f32.xlu0 %v1225_v35 }
 0x3cc   : > { %v1227_v38 = vpop.xlane.xlu0 %1226 }
 0x3cd   : > { %v1228_v39 = vsub.f32 %v1220_v33, %v1227_v38 }
 0x3cf   : > { %v1229_v40 = vmul.f32 1.442695, %v1228_v39 }
 0x3d1   : > { %3181 = vpow2.f32 %v1229_v40 }
 0x3db   : > { %v3182_v41 = vpop.eup %3181 }
 0x3dc   : > { %v1231_v42 = vsel %vm1224_vm3, %v3182_v41, 0.0 }
 0x3dd   : > { %1232 = vadd.xlane.f32.xlu0 %v1231_v42 }
 0x46a   : > { %v1233_v48 = vpop.xlane.xlu0 %1232 }
 0x46b   : > { %3183 = vrcp.f32 %v1233_v48 }
 0x475   : > { %v3184_v52 = vpop.eup %3183 }
 0x476   : > { %v1235_v53 = vmul.f32 %v3184_v52, %v3182_v41 }
 0x478   : > { %2736 = vmatmul.mubr.msk.f32.vlgmr.msra.gmra.mrb[4].mxu1 %vm1224_vm3, %v1235_v53 }
 0x479   : > { %2913 = vmatpush3.bf16.xpose.msk.msra.mxu1 %vm4165_vm2, %v2911_v54  ;;  %2742 = vmatprep.mubr.msk.f32.mxu1 %vm3596_vm0, %v3597_v1 }
 0x47a   : > { %2914 = vmatprep.subr.bf16.mxu1 %v3595_v0 }
 0x480   : > { %2743 = vmatmul.mubr.msk.f32.vlgmr.msra.gmra.mrb[6].mxu1 %vm1144_vm1, %v1310_v56 }
 0x481   : > { %2749 = vmatprep.mubr.msk.f32.mxu1 %vm3596_vm0, %v3597_v1 }
 0x54b   : > { %v4208_v57 = vpop.f32.mrb[4].mxu1 }
 0x54c   : > { %v2737_v58 = vpop.f32.mrb[5].mxu1 }
 0x54d   : > { %v1844_v58 = vld [vmem:[#allocation14] sm:$0xff] }
 0x553   : > { %v1387_v59 = vpop.f32.mrb[6].mxu1 }
 0x554   : > { %v2744_v60 = vpop.f32.mrb[7].mxu1  ;;  %v1391_v61 = vsel %vm1224_vm3, %v1387_v59, -inf }
 0x555   : > { %1392 = vmax.xlane.f32.xlu0 %v1391_v61  ;;  %v1846_v60 = vld [vmem:[#allocation14 + $0x10] sm:$0xff] }
 0x56b   : > { %3157 = vrot.lane.b32.xlu0 %v4196_v47, %s3598_s27 }
 0x56f   : > { %3162 = vrot.lane.b32.xlu0 %v4172_v7, %s3599_s13 }
 0x573   : > { %1483 = vrot.lane.b32.xlu0 %v4178_v8, %s3599_s13 }
 0x5e2   : > { %v1393_v62 = vpop.xlane.xlu0 %1392 }
 0x5e3   : > { %v1394_v63 = vsub.f32 %v1387_v59, %v1393_v62  ;;  %v1845_v59 = vld [vmem:[#allocation14 + $0x8] sm:$0xff]  ;;  %v1847_v62 = vld [vmem:[#allocation14 + $0x18] sm:$0xff] }
 0x5e4   : > { %v2932_v61 = vpack.c.bf16 %v1845_v59, %v1844_v58  ;;  %v1983_v59 = vld [vmem:[#allocation16 + $0x88] sm:$0xff] }
 0x5e5   : > { %v1395_v2 = vmul.f32 1.442695, %v1394_v63  ;;  %v2935_v63 = vpack.c.bf16 %v1847_v62, %v1846_v60  ;;  %v1985_v60 = vld [vmem:[#allocation16 + $0x98] sm:$0xff]  ;;  %v1982_v62 = vld [vmem:[#allocation16 + $0x80] sm:$0xff] }
 0x5e6   : > { %v3158_v3 = vpop.permute.xlu0 %3157  ;;  %2933 = vmatpush3.bf16.msra.mxu0 %v2932_v61  ;;  %v2971_v61 = vpack.c.bf16 %v1985_v60, %v1983_v59 }
 0x5e7   : > { %3185 = vpow2.f32 %v1395_v2  ;;  %v3160_v5 = vunpack.i.h.bf16 %v3158_v3  ;;  %v3159_v6 = vunpack.i.l.bf16 %v3158_v3  ;;  %2934 = vmatprep.subr.bf16.mxu0 %v3595_v0  ;;  %v1848_v2 = vld [vmem:[#allocation14 + $0x20] sm:$0xff]  ;;  %v1849_v3 = vld [vmem:[#allocation14 + $0x28] sm:$0xff] }
 0x5e9   : > { %v2915_v9 = vpack.c.bf16 %v3160_v5, %v3159_v6  ;;  %v2938_v5 = vpack.c.bf16 %v1849_v3, %v1848_v2  ;;  %v1850_v6 = vld [vmem:[#allocation14 + $0x30] sm:$0xff]  ;;  %v1987_v3 = vld [vmem:[#allocation16 + $0xa8] sm:$0xff] }
 0x5ea   : > { %v3163_v13 = vpop.permute.xlu0 %3162  ;;  %2936 = vmatpush3.bf16.msra.mxu0 %v2935_v63  ;;  %v1984_v63 = vld [vmem:[#allocation16 + $0x90] sm:$0xff] }
 0x5eb   : > { %2916 = vmatpush3.bf16.msra.mxu1 %v2915_v9  ;;  %v3165_v14 = vunpack.i.h.bf16 %v3163_v13  ;;  %v3164_v15 = vunpack.i.l.bf16 %v3163_v13  ;;  %2937 = vmatprep.subr.bf16.mxu0 %v3595_v0  ;;  %v1851_v9 = vld [vmem:[#allocation14 + $0x38] sm:$0xff]  ;;  %v1854_v13 = vld [vmem:[#allocation14 + $0x50] sm:$0xff]  ;;  %v2973_v2 = vpack.c.bf16 %v1984_v63, %v1982_v62  ;;  %v2479_v63 = vld [vmem:[%s4471_s2] ss:$0 sm:$0xff] }
 0x5ec   : > { %2917 = vmatprep.subr.bf16.mxu1 %v3595_v0 }
 0x5ed   : > { %v2918_v18 = vpack.c.bf16 %v3165_v14, %v3164_v15  ;;  %v1855_v14 = vld [vmem:[#allocation14 + $0x58] sm:$0xff] }
 0x5ee   : > { %v1484_v21 = vpop.permute.xlu0 %1483  ;;  %2939 = vmatpush3.bf16.msra.mxu0 %v2938_v5  ;;  %v2947_v15 = vpack.c.bf16 %v1855_v14, %v1854_v13  ;;  %v1989_v5 = vld [vmem:[#allocation16 + $0xb8] sm:$0xff]  ;;  %v1990_v14 = vld [vmem:[#allocation16 + $0xc0] sm:$0xff] }
 0x5ef   : > { %2940 = vmatprep.subr.bf16.mxu0 %v3595_v0 }
 0x5f1   : > { %v3186_v10 = vpop.eup %3185 }
 0x5f2   : > { %v1397_v11 = vsel %vm1224_vm3, %v3186_v10, 0.0 }
 0x5f3   : > { %1398 = vadd.xlane.f32.xlu1 %v1397_v11  ;;  %v1853_v11 = vld [vmem:[#allocation14 + $0x48] sm:$0xff] }
 0x604   : > { %3167 = vrot.lane.b32.xlu1 %v4196_v47, %s3599_s13 }
 0x608   : > { %3172 = vrot.lane.b32.xlu1 %v4172_v7, %s3600_s23 }
 0x680   : > { %v1399_v12 = vpop.xlane.xlu1 %1398 }
 0x681   : > { %3187 = vrcp.f32 %v1399_v12 }
 0x684   : > { %v3168_v19 = vpop.permute.xlu1 %3167 }
 0x685   : > { %v3170_v7 = vunpack.i.h.bf16 %v3168_v19  ;;  %v3169_v20 = vunpack.i.l.bf16 %v3168_v19  ;;  %v1858_v19 = vld [vmem:[#allocation14 + $0x70] sm:$0xff] }
 0x687   : > { %v2922_v22 = vpack.c.bf16 %v3170_v7, %v3169_v20  ;;  %v1859_v7 = vld [vmem:[#allocation14 + $0x78] sm:$0xff] }
 0x688   : > { %v3173_v33 = vpop.permute.xlu1 %3172  ;;  %v2953_v20 = vpack.c.bf16 %v1859_v7, %v1858_v19  ;;  %v1994_v7 = vld [vmem:[#allocation16 + $0xe0] sm:$0xff] }
 0x689   : > { %v3175_v35 = vunpack.i.h.bf16 %v3173_v33  ;;  %v3174_v36 = vunpack.i.l.bf16 %v3173_v33  ;;  %v1967_v33 = vld [vmem:[#allocation16 + $0x8] sm:$0xff] }
 0x68b   : > { %v3188_v16 = vpop.eup %3187  ;;  %v2925_v39 = vpack.c.bf16 %v3175_v35, %v3174_v36  ;;  %v1966_v35 = vld [vmem:[#allocation16] sm:$0xff] }
 0x68c   : > { %v1401_v17 = vmul.f32 %v3188_v16, %v3186_v10  ;;  %v2941_v10 = vpack.c.bf16 %v1851_v9, %v1850_v6  ;;  %v1856_v16 = vld [vmem:[#allocation14 + $0x60] sm:$0xff]  ;;  %v2975_v9 = vpack.c.bf16 %v1989_v5, %v1987_v3 }
 0x68d   : > { %v1986_v6 = vld [vmem:[#allocation16 + $0xa0] sm:$0xff] }
 0x68e   : > { %2750 = vmatmul.mubr.msk.f32.vlgmr.msra.gmra.mrb[8].mxu1 %vm1224_vm3, %v1401_v17  ;;  %2942 = vmatpush3.bf16.msra.mxu0 %v2941_v10  ;;  %v1857_v17 = vld [vmem:[#allocation14 + $0x68] sm:$0xff]  ;;  %v1988_v10 = vld [vmem:[#allocation16 + $0xb0] sm:$0xff]  ;;  %v2480_v3 = vld [vmem:[%s4472_s7] ss:$0 sm:$0xff]  ;;  %s2222_s7 = scalar_lea.sflag [#allocation4], %s4087_s20 }
 0x68f   : > { %2920 = vmatpush3.bf16.xpose.msk.msra.mxu1 %vm4165_vm2, %v2918_v18  ;;  %2756 = vmatprep.mubr.msk.f32.mxu1 %vm3596_vm0, %v3597_v1  ;;  %v2950_v18 = vpack.c.bf16 %v1857_v17, %v1856_v16  ;;  %v1995_v16 = vld [vmem:[#allocation16 + $0xe8] sm:$0xff]  ;;  %v1997_v17 = vld [vmem:[#allocation16 + $0xf8] sm:$0xff] }
 0x690   : > { %2921 = vmatprep.subr.bf16.mxu1 %v3595_v0  ;;  %2943 = vmatprep.subr.bf16.mxu0 %v3595_v0  ;;  %v2983_v19 = vpack.c.bf16 %v1997_v17, %v1995_v16 }
 0x696   : > { %2757 = vmatmul.mubr.msk.f32.vlgmr.msra.gmra.mrb[10].mxu1 %vm1144_vm1, %v1484_v21 }
 0x697   : > { %2923 = vmatpush3.bf16.msra.mxu1 %v2922_v22  ;;  %2763 = vmatprep.mubr.msk.f32.mxu1 %vm3596_vm0, %v3597_v1 }
 0x698   : > { %2924 = vmatprep.subr.bf16.mxu1 %v3595_v0 }
 0x761   : > { %v1479_v23 = vpop.f32.mrb[8].mxu1 }
 0x762   : > { %v2751_v24 = vpop.f32.mrb[9].mxu1 }
 0x769   : > { %v1561_v25 = vpop.f32.mrb[10].mxu1 }
 0x76a   : > { %v2758_v26 = vpop.f32.mrb[11].mxu1  ;;  %v1565_v27 = vsel %vm1224_vm3, %v1561_v25, -inf }
 0x76b   : > { %1566 = vmax.xlane.f32.xlu0 %v1565_v27 }
 0x7f8   : > { %v1567_v28 = vpop.xlane.xlu0 %1566 }
 0x7f9   : > { %v1568_v29 = vsub.f32 %v1561_v25, %v1567_v28 }
 0x7fb   : > { %v1569_v30 = vmul.f32 1.442695, %v1568_v29 }
 0x7fd   : > { %3189 = vpow2.f32 %v1569_v30 }
 0x807   : > { %v3190_v31 = vpop.eup %3189 }
 0x808   : > { %v1571_v32 = vsel %vm1224_vm3, %v3190_v31, 0.0 }
 0x809   : > { %1572 = vadd.xlane.f32.xlu1 %v1571_v32 }
 0x81a   : > { %1655 = vrot.lane.b32.xlu1 %v4178_v8, %s3600_s23 }
 0x896   : > { %v1573_v34 = vpop.xlane.xlu1 %1572 }
 0x897   : > { %3191 = vrcp.f32 %v1573_v34  ;;  %v1969_v34 = vld [vmem:[#allocation16 + $0x18] sm:$0xff] }
 0x898   : > { %v2955_v36 = vpack.c.bf16 %v1969_v34, %v1967_v33  ;;  %v2104_v33 = vld [vmem:[#allocation17 + $0xa8] sm:$0xff] }
 0x89a   : > { %v1656_v40 = vpop.permute.xlu1 %1655 }
 0x8a1   : > { %v3192_v37 = vpop.eup %3191 }
 0x8a2   : > { %v1575_v38 = vmul.f32 %v3192_v37, %v3190_v31  ;;  %v1968_v37 = vld [vmem:[#allocation16 + $0x10] sm:$0xff] }
 0x8a4   : > { %2764 = vmatmul.mubr.msk.f32.vlgmr.msra.gmra.mrb[12].mxu1 %vm1224_vm3, %v1575_v38  ;;  %v1973_v38 = vld [vmem:[#allocation16 + $0x38] sm:$0xff] }
 0x8a5   : > { %2927 = vmatpush3.bf16.xpose.msk.msra.mxu1 %vm4165_vm2, %v2925_v39  ;;  %2770 = vmatprep.mubr.msk.f32.mxu1 %vm3596_vm0, %v3597_v1  ;;  %v2957_v39 = vpack.c.bf16 %v1968_v37, %v1966_v35  ;;  %v2088_v37 = vld [vmem:[#allocation17 + $0x28] sm:$0xff] }
 0x8a6   : > { %2928 = vmatprep.subr.bf16.mxu1 %v3595_v0 }
 0x8ac   : > { %2771 = vmatmul.mubr.msk.f32.vlgmr.msra.gmra.mrb[14].mxu1 %vm1144_vm1, %v1656_v40 }
 0x8ad   : > { %2777 = vmatprep.mubr.msk.f32.mxu1 %vm3596_vm0, %v3597_v1 }
 0x977   : > { %v1651_v8 = vpop.f32.mrb[12].mxu1 }
 0x978   : > { %v2765_v41 = vpop.f32.mrb[13].mxu1 }
 0x979   : > { %v1972_v41 = vld [vmem:[#allocation16 + $0x30] sm:$0xff] }
 0x97f   : > { %v1733_v42 = vpop.f32.mrb[14].mxu1 }
 0x980   : > { %v2772_v43 = vpop.f32.mrb[15].mxu1  ;;  %v1737_v44 = vsel %vm1224_vm3, %v1733_v42, -inf }
 0x981   : > { %1738 = vmax.xlane.f32.xlu0 %v1737_v44  ;;  %v1977_v43 = vld [vmem:[#allocation16 + $0x58] sm:$0xff] }
 0x997   : > { %3177 = vrot.lane.b32.xlu0 %v4196_v47, %s3600_s23 }
 0x99b   : > { %1828 = vrot.lane.b32.xlu0 %v1479_v23, %s3600_s23 }
 0x99f   : > { %1832 = vrot.lane.b32.xlu0 %v1651_v8, %s3599_s13  ;;  %v1970_v8 = vld [vmem:[#allocation16 + $0x20] sm:$0xff] }
 0x9a0   : > { %v2961_v44 = vpack.c.bf16 %v1972_v41, %v1970_v8  ;;  %v2089_v8 = vld [vmem:[#allocation17 + $0x30] sm:$0xff]  ;;  %v2090_v41 = vld [vmem:[#allocation17 + $0x38] sm:$0xff] }
 0xa0e   : > { %v1739_v4 = vpop.xlane.xlu0 %1738 }
 0xa0f   : > { %v1740_v45 = vsub.f32 %v1733_v42, %v1739_v4  ;;  %v1975_v42 = vld [vmem:[#allocation16 + $0x48] sm:$0xff] }
 0xa10   : > { %v2963_v4 = vpack.c.bf16 %v1977_v43, %v1975_v42  ;;  %v2107_v42 = vld [vmem:[#allocation17 + $0xc0] sm:$0xff]  ;;  %v2108_v43 = vld [vmem:[#allocation17 + $0xc8] sm:$0xff] }
 0xa11   : > { %v1741_v46 = vmul.f32 1.442695, %v1740_v45  ;;  %v1976_v45 = vld [vmem:[#allocation16 + $0x50] sm:$0xff] }
 0xa12   : > { %v3178_v48 = vpop.permute.xlu0 %3177 }
 0xa13   : > { %3193 = vpow2.f32 %v1741_v46  ;;  %v3180_v49 = vunpack.i.h.bf16 %v3178_v48  ;;  %v3179_v50 = vunpack.i.l.bf16 %v3178_v48 }
 0xa15   : > { %v2929_v51 = vpack.c.bf16 %v3180_v49, %v3179_v50 }
 0xa16   : > { %v1829_v23 = vpop.permute.xlu0 %1828 }
 0xa17   : > { %2930 = vmatpush3.bf16.msra.mxu1 %v2929_v51  ;;  %v1839_v25 = vsel %vm1144_vm1, %v4208_v57, %v1829_v23  ;;  %v1971_v57 = vld [vmem:[#allocation16 + $0x28] sm:$0xff] }
 0xa18   : > { %v2959_v40 = vpack.c.bf16 %v1973_v38, %v1971_v57  ;;  %2956 = vmatprep.subr.bf16.mxu1 %v2955_v36  ;;  %v2100_v23 = vld [vmem:[#allocation17 + $0x88] sm:$0xff]  ;;  %v2087_v36 = vld [vmem:[#allocation17 + $0x20] sm:$0xff]  ;;  %v2105_v57 = vld [vmem:[#allocation17 + $0xb0] sm:$0xff] }
 0xa19   : > { %v2106_v38 = vld [vmem:[#allocation17 + $0xb8] sm:$0xff] }
 0xa1a   : > { %v1833_v24 = vpop.permute.xlu0 %1832 }
 0xa1b   : > { %v1841_v26 = vsel %vm1840_vm4, %v1839_v25, %v1833_v24  ;;  %v2083_v24 = vld [vmem:[#allocation17] sm:$0xff] }
 0xa1d   : > { %v3194_v52 = vpop.eup %3193 }
 0xa1e   : > { %v1743_v53 = vsel %vm1224_vm3, %v3194_v52, 0.0 }
 0xa1f   : > { %1744 = vadd.xlane.f32.xlu1 %v1743_v53  ;;  %v1981_v53 = vld [vmem:[#allocation16 + $0x78] sm:$0xff] }
 0xaac   : > { %v1745_v54 = vpop.xlane.xlu1 %1744 }
 0xaad   : > { %3195 = vrcp.f32 %v1745_v54 }
 0xab7   : > { %v3196_v47 = vpop.eup %3195 }
 0xab8   : > { %v1747_v56 = vmul.f32 %v3196_v47, %v3194_v52  ;;  %v1979_v52 = vld [vmem:[#allocation16 + $0x68] sm:$0xff]  ;;  %v1978_v47 = vld [vmem:[#allocation16 + $0x60] sm:$0xff] }
 0xab9   : > { %v2967_v54 = vpack.c.bf16 %v1981_v53, %v1979_v52  ;;  %v2093_v52 = vld [vmem:[#allocation17 + $0x50] sm:$0xff]  ;;  %v2094_v53 = vld [vmem:[#allocation17 + $0x58] sm:$0xff] }
 0xaba   : > { %2778 = vmatmul.mubr.msk.f32.vlgmr.msra.gmra.mrb[16].mxu1 %vm1224_vm3, %v1747_v56  ;;  %v1980_v56 = vld [vmem:[#allocation16 + $0x70] sm:$0xff] }
 0xabb   : > { %2074 = vmatprep.mubr.f32.mxu1 %v3597_v1  ;;  %v1852_v1 = vld [vmem:[#allocation14 + $0x40] sm:$0xff]  ;;  %2958 = vmatpush1.bf16.msra.mxu1 %v2957_v39  ;;  %v2969_v58 = vpack.c.bf16 %v1980_v56, %v1978_v47  ;;  %v2997_v39 = vpack.c.bf16 %v2088_v37, %v2087_v36  ;;  %v2112_v47 = vld [vmem:[#allocation17 + $0xe8] sm:$0xff]  ;;  %v3009_v56 = vpack.c.bf16 %v2094_v53, %v2093_v52 }
 0xabc   : > { %v2944_v12 = vpack.c.bf16 %v1853_v11, %v1852_v1  ;;  %2960 = vmatprep.subr.bf16.mxu1 %v2959_v40  ;;  %v1991_v1 = vld [vmem:[#allocation16 + $0xc8] sm:$0xff]  ;;  %v1993_v11 = vld [vmem:[#allocation16 + $0xd8] sm:$0xff]  ;;  %v2999_v40 = vpack.c.bf16 %v2106_v38, %v2105_v57 }
 0xabd   : > { %v2979_v13 = vpack.c.bf16 %v1993_v11, %v1991_v1  ;;  %v2113_v11 = vld [vmem:[#allocation17 + $0xf0] sm:$0xff] }
 0xabe   : > { %2945 = vmatpush3.bf16.msra.mxu0 %v2944_v12  ;;  %v2977_v12 = vpack.c.bf16 %v1988_v10, %v1986_v6  ;;  %v2096_v10 = vld [vmem:[#allocation17 + $0x68] sm:$0xff] }
 0xabf   : > { %2946 = vmatprep.subr.bf16.mxu0 %v3595_v0  ;;  %2962 = vmatpush1.bf16.msra.mxu1 %v2961_v44  ;;  %v3001_v44 = vpack.c.bf16 %v2090_v41, %v2089_v8  ;;  %v2483_v41 = vld [vmem:[%s4477_s25] ss:$0 sm:$0xff] }
 0xac0   : > { %2964 = vmatprep.subr.bf16.mxu1 %v2963_v4  ;;  %v3003_v4 = vpack.c.bf16 %v2108_v43, %v2107_v42 }
 0xac2   : > { %2948 = vmatpush3.bf16.msra.mxu0 %v2947_v15  ;;  %v1992_v15 = vld [vmem:[#allocation16 + $0xd0] sm:$0xff] }
 0xac3   : > { %2949 = vmatprep.subr.bf16.mxu0 %v3595_v0 }
 0xac6   : > { %2951 = vmatpush3.bf16.msra.mxu0 %v2950_v18  ;;  %v2981_v18 = vpack.c.bf16 %v1992_v15, %v1990_v14  ;;  %v2097_v14 = vld [vmem:[#allocation17 + $0x70] sm:$0xff]  ;;  %v2098_v15 = vld [vmem:[#allocation17 + $0x78] sm:$0xff] }
 0xac7   : > { %2952 = vmatprep.subr.bf16.mxu0 %v3595_v0  ;;  %v2478_v0 = vld [vmem:[%s4470_s26] ss:$0 sm:$0xff]  ;;  %v3017_v16 = vpack.c.bf16 %v2098_v15, %v2097_v14  ;;  %s845_s26 = scalar_lea.vmem [#allocation19], %s4090_s29  ;;  %s3601_s29 = smov [#allocation19]  }
 0xac8   : > { %s2235_s15 = sshll.u32 %s845_s26, 4  ;;  %s3493_s0 = sshll.u32 %s3601_s29, 4  ;;  %s4298_s15 = int_to_ptr.vmem [resolvable:$true] %s2235_s15  ;;  %s3494_s0 = int_to_ptr.vmem [resolvable:$false] %s3493_s0 }
 0xac9   : > { %s3489_s9 = scalar_lea.vmem %s4298_s15, 128  ;;  %s3495_s19 = scalar_lea.vmem %s3494_s0, 256 }
 0xaca   : > { %2954 = vmatpush3.bf16.msra.mxu0 %v2953_v20  ;;  %v1996_v20 = vld [vmem:[#allocation16 + $0xf0] sm:$0xff]  ;;  %p3490_p10 = scmp.ne.s32.totalorder %s4298_s15, %s3489_s9  ;;  %p3496_p2 = scmp.lt.s32.totalorder %s4298_s15, %s3494_s0 }
 0xacb   : > { %p3497_p8 = scmp.lt.s32.totalorder %s3495_s19, %s3489_s9 }
 0xacd   : > { %p3498_p12 = por %p3497_p8, %p3496_p2 }
 0xb8d   : > { %v1823_v21 = vpop.f32.mrb[16].mxu1 }
 0xb8e   : > { %1836 = vrot.lane.b32.xlu0 %v1823_v21, %s3598_s27  ;;  %v2779_v22 = vpop.f32.mrb[17].mxu1  ;;  %v2985_v21 = vpack.c.bf16 %v1996_v20, %v1994_v7  ;;  %s4475_s27 = sld [smem:[#allocation34_spill]] }
 0xb8f   : > { %v2099_v22 = vld [vmem:[#allocation17 + $0x80] sm:$0xff] }
 0xb90   : > { %v2987_v25 = vpack.c.bf16 %v2100_v23, %v2099_v22 }
 0xb92   : > { %2988 = vmatprep.subr.bf16.mxu0 %v2987_v25 }
 0xb94   : > { %p4479_p13 = scmp.ne.s32.totalorder %s4475_s27, 0 }
 0xb96   : > { %p3491_p5 = pnand %p3490_p10, %p4479_p13 }
 0xb98   : > { %p3492_p9 = pneg %p3491_p5 }
 0xb9a   : > { %p3499_p11 = pnand %p3498_p12, %p3492_p9 }
 0xc00   : > { %v1837_v27 = vpop.permute.xlu0 %1836 }
 0xc01   : > { %v1843_v28 = vsel %vm1842_vm5, %v1841_v26, %v1837_v27  ;;  %v2084_v26 = vld [vmem:[#allocation17 + $0x8] sm:$0xff]  ;;  %v2101_v27 = vld [vmem:[#allocation17 + $0x90] sm:$0xff] }
 0xc02   : > { %2813 = vmatmul.mubr.f32.vlgmr.msra.gmra.mrb[4].mxu0 %v1843_v28  ;;  %v2102_v28 = vld [vmem:[#allocation17 + $0x98] sm:$0xff] }
 0xcd5   : > { %v1933_v29 = vpop.f32.mrb[4].mxu0 }
 0xcd6   : > { %v1934_v30 = vadd.f32 %v2478_v0, %v1933_v29  ;;  %v2814_v31 = vpop.f32.mrb[5].mxu0  ;;  %v2989_v0 = vpack.c.bf16 %v2084_v26, %v2083_v24  ;;  %v2991_v29 = vpack.c.bf16 %v2102_v28, %v2101_v27 }
 0xcd7   : > { %v2086_v31 = vld [vmem:[#allocation17 + $0x18] sm:$0xff] }
 0xcd8   : > { %v1937_v32 = vadd.f32 %v1934_v30, %v4149_v55  ;;  %v1974_v55 = vld [vmem:[#allocation16 + $0x40] sm:$0xff]  ;;  %v2085_v30 = vld [vmem:[#allocation17 + $0x10] sm:$0xff]  ;;  %2990 = vmatpush3.bf16.msra.mxu0 %v2989_v0 }
 0xcd9   : > { %v2965_v46 = vpack.c.bf16 %v1976_v45, %v1974_v55  ;;  %v2993_v34 = vpack.c.bf16 %v2086_v31, %v2085_v30  ;;  %2992 = vmatprep.subr.bf16.mxu0 %v2991_v29  ;;  %v2091_v55 = vld [vmem:[#allocation17 + $0x40] sm:$0xff]  ;;  %v2092_v45 = vld [vmem:[#allocation17 + $0x48] sm:$0xff] }
 0xcda   : > { %1940 = vadd.xlane.f32.xlu1 %v1937_v32  ;;  %v2481_v0 = vld [vmem:[%s4474_s3] ss:$0 sm:$0xff] }
 0xcdb   : > { %2966 = vmatpush1.bf16.msra.mxu1 %v2965_v46  ;;  %v2109_v46 = vld [vmem:[#allocation17 + $0xd0] sm:$0xff] }
 0xcdc   : > { %2968 = vmatprep.subr.bf16.mxu1 %v2967_v54  ;;  %2994 = vmatpush3.bf16.msra.mxu0 %v2993_v34  ;;  %v2111_v54 = vld [vmem:[#allocation17 + $0xe0] sm:$0xff] }
 0xcdf   : > { %2970 = vmatpush1.bf16.msra.mxu1 %v2969_v58  ;;  %v3011_v58 = vpack.c.bf16 %v2112_v47, %v2111_v54 }
 0xce0   : > { %2972 = vmatprep.subr.bf16.mxu1 %v2971_v61 }
 0xce3   : > { %2974 = vmatpush1.bf16.msra.mxu1 %v2973_v2 }
 0xce4   : > { %2976 = vmatprep.subr.bf16.mxu1 %v2975_v9  ;;  %v2095_v9 = vld [vmem:[#allocation17 + $0x60] sm:$0xff] }
 0xce5   : > { %v3013_v1 = vpack.c.bf16 %v2096_v10, %v2095_v9 }
 0xce7   : > { %2978 = vmatpush1.bf16.msra.mxu1 %v2977_v12  ;;  %v2114_v12 = vld [vmem:[#allocation17 + $0xf8] sm:$0xff] }
 0xce8   : > { %2980 = vmatprep.subr.bf16.mxu1 %v2979_v13  ;;  %v3015_v13 = vpack.c.bf16 %v2114_v12, %v2113_v11 }
 0xceb   : > { %2982 = vmatpush1.bf16.msra.mxu1 %v2981_v18 }
 0xcec   : > { %2984 = vmatprep.subr.bf16.mxu1 %v2983_v19  ;;  %v1998_v19 = vld [vmem:[%s4473_s21] sm:$0x3] }
 0xcef   : > { %2986 = vmatpush1.bf16.msra.mxu1 %v2985_v21 }
 0xd67   : > { %v1941_v48 = vpop.xlane.xlu1 %1940 }
 0xd68   : > { %v1943_v49 = vmul.f32 0.0078125, %v1941_v48  ;;  %v2110_v48 = vld [vmem:[#allocation17 + $0xd8] sm:$0xff] }
 0xd6a   : > { %v4268_v50 = vsub.f32 %v1937_v32, %v1943_v49  ;;  %v2103_v32 = vld [vmem:[#allocation17 + $0xa0] sm:$0xff]  ;;  %v3005_v49 = vpack.c.bf16 %v2092_v45, %v2091_v55 }
 0xd6b   : > { %v2995_v35 = vpack.c.bf16 %v2104_v33, %v2103_v32 }
 0xd6c   : > { %v1945_v51 = vmul.f32 %v4268_v50, %v4268_v50 }
 0xd6d   : > { %2996 = vmatprep.subr.bf16.mxu0 %v2995_v35 }
 0xd6e   : > { %1946 = vadd.xlane.f32.xlu0 %v1945_v51  ;;  %2998 = vmatpush3.bf16.msra.mxu0 %v2997_v39  ;;  %v3007_v51 = vpack.c.bf16 %v2110_v48, %v2109_v46 }
 0xd6f   : > { %3000 = vmatprep.subr.bf16.mxu0 %v2999_v40  ;;  %v2482_v40 = vld [vmem:[%s4476_s1] ss:$0 sm:$0xff] }
 0xd72   : > { %3002 = vmatpush3.bf16.msra.mxu0 %v3001_v44 }
 0xd73   : > { %3004 = vmatprep.subr.bf16.mxu0 %v3003_v4 }
 0xd76   : > { %3006 = vmatpush3.bf16.msra.mxu0 %v3005_v49 }
 0xd77   : > { %3008 = vmatprep.subr.bf16.mxu0 %v3007_v51 }
 0xd7a   : > { %3010 = vmatpush3.bf16.msra.mxu0 %v3009_v56 }
 0xd7b   : > { %3012 = vmatprep.subr.bf16.mxu0 %v3011_v58 }
 0xd7e   : > { %3014 = vmatpush3.bf16.msra.mxu0 %v3013_v1 }
 0xd7f   : > { %3016 = vmatprep.subr.bf16.mxu0 %v3015_v13 }
 0xd82   : > { %3018 = vmatpush3.bf16.msra.mxu0 %v3017_v16 }
 0xdfb   : > { %v1947_v59 = vpop.xlane.xlu0 %1946 }
 0xdfc   : > { %v1948_v60 = vmul.f32 0.0078125, %v1947_v59 }
 0xdfe   : > { %v1949_v61 = vadd.f32 1e-05, %v1948_v60 }
 0xe00   : > { %3197 = vrsqrt.f32 %v1949_v61 }
 0xe0a   : > { %v3198_v62 = vpop.eup %3197 }
 0xe0b   : > { %v1951_v2 = vmul.f32 %v3198_v62, %v4268_v50  ;;  %v2000_v50 = vlaneseq }
 0xe0d   : > { %v1958_v5 = vmul.f32 %v2479_v63, %v1951_v2  ;;  %v2001_v17 = vshrl.u32 %v2000_v50, 7 }
 0xe0f   : > { %v1965_v6 = vadd.f32 %v2480_v3, %v1958_v5  ;;  %v2002_v18 = vsub.s32 0, %v2001_v17  ;;  %v2006_v7 = vsub.s32 1, %v2001_v17 }
 0xe11   : > { %2075 = vmatmul.mubr.f32.vlgmr.msra.gmra.mrb[18].mxu1 %v1965_v6  ;;  %v2003_v20 = vrot.slane %v1998_v19, %v2002_v18  ;;  %v2007_v21 = vrot.slane %v1998_v19, %v2006_v7 }
 0xee4   : > { %v2076_v22 = vpop.f32.mrb[18].mxu1 }
 0xee5   : > { %v2077_v23 = vadd.f32 %v2076_v22, %v2003_v20  ;;  %v2078_v24 = vpop.f32.mrb[19].mxu1 }
 0xee6   : > { %v2079_v25 = vadd.f32 %v2078_v24, %v2007_v21 }
 0xee7   : > { %v2081_v27 = vmax.f32 %v2077_v23, 0.0 }
 0xee8   : > { %v2082_v26 = vmax.f32 %v2079_v25, 0.0 }
 0xeea   : > { %2186 = vmatprep.mubr.f32.mxu0 %v2082_v26 }
 0xeeb   : > { %2187 = vmatmul.mubr.f32.vlgmr.msra.gmra.mrb[6].mxu0 %v2081_v27 }
 0xfbe   : > { %v2616_v28 = vpop.f32.mrb[6].mxu0 }
 0xfbf   : > { %v2617_v29 = vpop.f32.mrb[7].mxu0 }
 0xfc0   : > { %v2618_v30 = vadd.f32 %v2617_v29, %v2616_v28 }
 0xfc2   : > { %v2189_v31 = vadd.f32 %v2618_v30, %v2481_v0 }
 0xfc4   : > { %v2192_v32 = vadd.f32 %v2189_v31, %v1965_v6 }
 0xfc6   : > { %2195 = vadd.xlane.f32.xlu1 %v2192_v32 }
0x1053   : > { %v2196_v33 = vpop.xlane.xlu1 %2195 }
0x1054   : > { %v2197_v34 = vmul.f32 0.0078125, %v2196_v33 }
0x1056   : > { %v2198_v35 = vsub.f32 %v2192_v32, %v2197_v34 }
0x1058   : > { %v2199_v36 = vmul.f32 %v2198_v35, %v2198_v35 }
0x105a   : > { %2200 = vadd.xlane.f32.xlu1 %v2199_v36 }
0x10e7   : > { %v2201_v37 = vpop.xlane.xlu1 %2200 }
0x10e8   : > { %v2202_v57 = vmul.f32 0.0078125, %v2201_v37 }
0x10ea   : > { %v2203_v38 = vadd.f32 1e-05, %v2202_v57 }
0x10ec   : > { %3199 = vrsqrt.f32 %v2203_v38 }
0x10f6   : > { %v3200_v39 = vpop.eup %3199 }
0x10f7   : > { %v2205_v8 = vmul.f32 %v3200_v39, %v2198_v35 }
0x10f9   : > { %v2212_v42 = vmul.f32 %v2482_v40, %v2205_v8 }
0x10fb   : > { %v2219_v43 = vadd.f32 %v2483_v41, %v2212_v42 }
0x10fd   : > { %2220 = vst [vmem:[%s845_s26] sm:$0xff] %v2219_v43 }
0x10fe   : > { %3502 = shalt.err (!%p3499_p11)
}
0x10ff   : > { %s3503_s20 = scalar_lea.hbm %s4296_s18, 128  ;;  %s3507_s5 = scalar_lea.hbm %s4478_s30, 256 }
0x1100   : > { %p3504_p3 = scmp.ne.s32.totalorder %s4296_s18, %s3503_s20  ;;  %p3508_p0 = scmp.lt.u32.totalorder %s4296_s18, %s4478_s30 }
0x1101   : > { %p3509_p4 = scmp.lt.u32.totalorder %s3507_s5, %s3503_s20  ;;  %p3511_p10 = scmp.lt.u32.totalorder %s3503_s20, %s4296_s18 }
0x1102   : > { %p3505_p1 = pnand %p3504_p3, %p4479_p13 }
0x1103   : > { %p3510_p7 = por %p3509_p4, %p3508_p0 }
0x1104   : > { %p3506_p6 = pneg %p3505_p1 }
0x1105   : > { %p3512_p5 = por %p3511_p10, %p3510_p7 }
0x1107   : > { %p3513_p9 = pnand %p3512_p5, %p3506_p6 }
0x1109   : > { %3516 = shalt.err (!%p3513_p9)
}
0x110a   : > { %3051 = dma.vmem_to_hbm [thread:$0]  (%p4479_p13), %s4298_s15, 128, %s4296_s18, %s2222_s7  }
0x110b PF: > { %s4480_s28 = sld [smem:[#allocation28_spill]]  ;;  %s4481_s1 = sld [smem:[#allocation35_spill]] }
0x110c   : > { %p4483_p8 = scmp.ge.s32.totalorder %s3579_s24, 2 }
0x1111   : > { %s2247_s13 = sand.u32 1, %s4480_s28   ;;  %p4482_p2 = scmp.ne.s32.totalorder %s4481_s1, 0 }
0x1112   : > { %s2248_s23 = scalar_lea.sflag [#allocation4], %s2247_s13 }
0x1113   : > { %p3086_p12 = pnand %p4483_p8, %p4482_p2 }
0x1115   : > { %3562 = dma.done.wait (!%p3086_p12), %s2248_s23, 128  }
0x1116   : > { %3564 = vsyncadd (!%p3086_p12), %s2248_s23, 4294967168  ;;  %s4484_s24 = sld [smem:[#allocation31_spill]]  ;;  %s4485_s25 = sld [smem:[#allocation29_spill]] }
0x1117   : > { %s4486_s23 = sld [smem:[#allocation32_spill]]  ;;  %s4487_s1 = smov %s3571_s22 }
0x111c   : > { %p42_p11 = scmp.ge.s32.totalorder %s4484_s24, 4   ;;  %s4488_s22 = smov %s4485_s25 }
0x111e   :  { %44 = sbr.rel (!%p42_p11) target bundleno = 32 (0x20), region = 206 }
0x1125   :  { %2253 = vsyncpa [#allocation3], 1 }
0x1126   :  { %2255 = vsyncpa [#allocation3 + $0x1], 1 }
0x1127   :  { %2256 = vsyncpa [#allocation6], 1 }
0x1128   :  { %2258 = vsyncpa [#allocation6 + $0x1], 1 }
0x1129   :  { %2259 = vsyncpa [#allocation9], 1 }
0x112a   :  { %2261 = vsyncpa [#allocation9 + $0x1], 1 }
0x112b   :  { %2262 = vsyncpa [#allocation12], 1 }
0x112c   :  { %2263 = vsyncpa [#allocation15], 1 }
0x112d   :  { %2264 = vsyncpa [#allocation18], 1 }
0x112e   :  { %2265 = vsyncpa [#allocation4], 1 }
0x112f   :  { %2267 = vsyncpa [#allocation4 + $0x1], 1 }

</bundles_post_ra>
